<compile_context>
chip_gen: v5e
topology: v5e:2x2
jax: 0.10.0
libtpu: 0.0.40
codegen_flags: <defaults>
</compile_context>

<pallas_src>
import jax
import jax.numpy as jnp
from jax.experimental import pallas as pl
from jax.experimental.pallas import tpu as pltpu

_VMEM_LIMIT = 32 * 1024 * 1024  # explicit scoped-VMEM budget, safe on v5e/v6e/v7x


def _round_up(x, m):
    return (x + m - 1) // m * m


def _pick_tile(m, *, gran=16, tile_max=1024, min_steps=2):
    """Row-tile size: multiple of `gran` (keeps bf16 (16,128) tiling / reshapes
    layout-preserving), as large as possible for step-overhead amortization, but
    targeting >= `min_steps` grid steps so v7x's 2 TensorCores both get work."""
    t = _round_up(max(1, -(-m // min_steps)), gran)
    return max(gran, min(tile_max, t))


# ----------------------------- Pallas kernels ------------------------------

def conv_pool_relu_kernel(p_ref, w_ref, b_ref, o_ref):
    """Fused: (KxK valid conv as im2col matmul) -> 2x2 maxpool -> bias -> ReLU.

    p_ref: (4, TM, F) bf16  pool sub-position major, rows (n, ph, pw) inside.
    w_ref: (F, OCP)   bf16  conv weight, feature order (kh, kw, c), OC padded to 128.
    b_ref: (1, OCP)   f32   conv bias (added after max-pool; identical result).
    o_ref: (TM, OCP)  bf16  pooled + ReLU'd activations (bf16 writeback).
    """
    w = w_ref[...]
    # Four matmuls share the same VMEM-resident RHS; f32 MXU accumulation.
    y0 = jnp.dot(p_ref[0], w, preferred_element_type=jnp.float32)
    y1 = jnp.dot(p_ref[1], w, preferred_element_type=jnp.float32)
    y2 = jnp.dot(p_ref[2], w, preferred_element_type=jnp.float32)
    y3 = jnp.dot(p_ref[3], w, preferred_element_type=jnp.float32)
    pooled = jnp.maximum(jnp.maximum(y0, y1), jnp.maximum(y2, y3))
    o_ref[...] = jnp.maximum(pooled + b_ref[...], 0.0).astype(o_ref.dtype)


def mlp_head_kernel(x_ref, w1_ref, b1_ref, w2_ref, b2_ref, o_ref):
    """Fused head: Linear(1024,128) -> (Dropout=id) -> ReLU -> Linear(128,10pad)."""
    h = jnp.dot(x_ref[...], w1_ref[...], preferred_element_type=jnp.float32) + b1_ref[...]
    h = jnp.maximum(h, 0.0).astype(w2_ref.dtype)
    o_ref[...] = jnp.dot(h, w2_ref[...], preferred_element_type=jnp.float32) + b2_ref[...]


# ----------------------------- pallas_call wrappers -------------------------

def conv_pool_relu(patches, w, b, *, tile_max=1024):
    """patches: (4, M, F) bf16, w: (F, OCP) bf16, b: (1, OCP) f32 -> (M, OCP) bf16."""
    _, m, f = patches.shape
    ocp = w.shape[1]
    tm = _pick_tile(m, tile_max=tile_max)
    m_pad = _round_up(m, tm)
    if m_pad != m:
        patches = jnp.pad(patches, ((0, 0), (0, m_pad - m), (0, 0)))
    bytes_acc = (4 * m_pad * f + f * ocp + m_pad * ocp) * 2 + ocp * 4
    out = pl.pallas_call(
        conv_pool_relu_kernel,
        out_shape=jax.ShapeDtypeStruct((m_pad, ocp), jnp.bfloat16),
        grid=(m_pad // tm,),
        in_specs=[
            pl.BlockSpec((4, tm, f), lambda i: (0, i, 0)),   # tiled over M; last dim = full F
            pl.BlockSpec((f, ocp), lambda i: (0, 0)),        # weights VMEM-resident
            pl.BlockSpec((1, ocp), lambda i: (0, 0)),        # bias VMEM-resident
        ],
        out_specs=pl.BlockSpec((tm, ocp), lambda i: (i, 0)),
        compiler_params=pltpu.CompilerParams(
            dimension_semantics=("parallel",),
            vmem_limit_bytes=_VMEM_LIMIT),
        cost_estimate=pl.CostEstimate(
            flops=2 * 4 * m_pad * f * ocp,
            transcendentals=0,
            bytes_accessed=bytes_acc),
    )(patches, w, b)
    return out[:m] if m_pad != m else out


def mlp_head(x, w1, b1, w2, b2, *, tile_max=512):
    """x: (N, F) bf16 -> (N, 128) f32 logits (last dim padded to 128 lanes)."""
    n, f = x.shape
    hdim = w1.shape[1]
    ocp = w2.shape[1]
    tn = _pick_tile(n, tile_max=tile_max)
    n_pad = _round_up(n, tn)
    if n_pad != n:
        x = jnp.pad(x, ((0, n_pad - n), (0, 0)))
    bytes_acc = (n_pad * f + f * hdim + hdim * ocp) * 2 + (n_pad + 2) * ocp * 4
    out = pl.pallas_call(
        mlp_head_kernel,
        out_shape=jax.ShapeDtypeStruct((n_pad, ocp), jnp.float32),
        grid=(n_pad // tn,),
        in_specs=[
            pl.BlockSpec((tn, f), lambda i: (i, 0)),
            pl.BlockSpec((f, hdim), lambda i: (0, 0)),
            pl.BlockSpec((1, hdim), lambda i: (0, 0)),
            pl.BlockSpec((hdim, ocp), lambda i: (0, 0)),
            pl.BlockSpec((1, ocp), lambda i: (0, 0)),
        ],
        out_specs=pl.BlockSpec((tn, ocp), lambda i: (i, 0)),
        compiler_params=pltpu.CompilerParams(
            dimension_semantics=("parallel",),
            vmem_limit_bytes=_VMEM_LIMIT),
        cost_estimate=pl.CostEstimate(
            flops=2 * n_pad * f * hdim + 2 * n_pad * hdim * ocp,
            transcendentals=0,
            bytes_accessed=bytes_acc),
    )(x, w1, b1, w2, b2)
    return out[:n] if n_pad != n else out


# ----------------------------- JAX glue (layout only) -----------------------

def im2col_nhwc(x, k, c_take=None):
    """x: (N, H, W, C) -> (N, OH, OW, k*k*c_take) via static slices, order (kh, kw, c).

    `c_take` folds a channel slice into each tap (avoids a full-array slice copy)."""
    n, h, w, c = x.shape
    oh, ow = h - k + 1, w - k + 1
    cs = c if c_take is None else c_take
    taps = [x[:, dh:dh + oh, dw:dw + ow, :cs] for dh in range(k) for dw in range(k)]
    return jnp.concatenate(taps, axis=-1)


def pool_grouped(patches):
    """(N, OH, OW, F) -> (4, N*PH*PW, F): leading axis = 2x2 pool sub-position."""
    n, oh, ow, f = patches.shape
    ph, pw = oh // 2, ow // 2
    p = patches.reshape(n, ph, 2, pw, 2, f)
    p = jnp.transpose(p, (2, 4, 0, 1, 3, 5))   # (2, 2, N, PH, PW, F)
    return p.reshape(4, n * ph * pw, f)


def mnist_cnn_forward(x, params):
    """x: (N, 1, 28, 28) f32 -> logits (N, 10). Dropout = identity (eval)."""
    n = x.shape[0]
    bf16 = jnp.bfloat16
    x = jnp.transpose(x, (0, 2, 3, 1)).astype(bf16)                   # NHWC once, bf16
    # conv1: Conv2d(1,32,5) -> MaxPool2d(2) -> Dropout -> ReLU
    p1 = pool_grouped(im2col_nhwc(x, 5))                              # (4, N*144, 25) bf16 (no K pad)
    a1 = conv_pool_relu(p1, params["w1"], params["b1"])               # (N*144, 128) bf16
    a1 = a1.reshape(n, 12, 12, 128)
    # conv2: Conv2d(32,64,5) -> MaxPool2d(2) -> Dropout -> ReLU -> Flatten
    p2 = pool_grouped(im2col_nhwc(a1, 5, c_take=32))                  # (4, N*16, 800) bf16
    a2 = conv_pool_relu(p2, params["w2"], params["b2"])               # (N*16, 128) bf16
    # (h, w, cpad) flatten; torch's (c, h, w) Flatten order is folded into w3.
    feat = a2.reshape(n, 4 * 4 * 128)                                 # (N, 2048) bf16
    logits = mlp_head(feat, params["w3"], params["b3"], params["w4"], params["b4"])
    return logits[:, :10]


# ----------------------------- params & reference ---------------------------

def init_params(key):
    ks = jax.random.split(key, 8)
    bf16 = jnp.bfloat16

    def u(k, shape, fan_in):
        bound = 1.0 / jnp.sqrt(jnp.float32(fan_in))
        return jax.random.uniform(k, shape, jnp.float32, -bound, bound)

    w1_oihw = u(ks[0], (32, 1, 5, 5), 25)
    b1 = u(ks[1], (32,), 25)
    w2_oihw = u(ks[2], (64, 32, 5, 5), 800)
    b2 = u(ks[3], (64,), 800)
    w3 = u(ks[4], (1024, 128), 1024)
    b3 = u(ks[5], (128,), 1024)
    w4 = u(ks[6], (128, 10), 128)
    b4 = u(ks[7], (10,), 128)

    # conv weights: (O,C,kh,kw) -> (kh,kw,C,O), OC padded to 128 lanes, bf16.
    # conv1 K stays 25 (no K padding; the BlockSpec uses the full-extent last dim).
    w1_k = jnp.transpose(w1_oihw, (2, 3, 1, 0)).reshape(25, 32)
    w1_k = jnp.pad(w1_k, ((0, 0), (0, 128 - 32))).astype(bf16)
    w2_k = jnp.transpose(w2_oihw, (2, 3, 1, 0)).reshape(800, 64)
    w2_k = jnp.pad(w2_k, ((0, 0), (0, 128 - 64))).astype(bf16)
    b1_k = jnp.pad(b1, (0, 128 - 32)).reshape(1, 128)
    b2_k = jnp.pad(b2, (0, 128 - 64)).reshape(1, 128)
    # fc1: fold torch Flatten (c,h,w) order + 128-channel padding into the rows
    w3_k = jnp.transpose(w3.reshape(64, 4, 4, 128), (1, 2, 0, 3))     # (h, w, c, out)
    w3_k = jnp.pad(w3_k, ((0, 0), (0, 0), (0, 64), (0, 0))).reshape(2048, 128).astype(bf16)
    b3_k = b3.reshape(1, 128)
    # fc2: pad 10 logits to 128 lanes (sliced back in the wrapper)
    w4_k = jnp.pad(w4, ((0, 0), (0, 128 - 10))).astype(bf16)
    b4_k = jnp.pad(b4, (0, 128 - 10)).reshape(1, 128)

    return dict(
        # kernel params
        w1=w1_k, b1=b1_k, w2=w2_k, b2=b2_k, w3=w3_k, b3=b3_k, w4=w4_k, b4=b4_k,
        # reference params (unpadded / torch layout)
        w1_oihw=w1_oihw, b1_ref=b1, w2_oihw=w2_oihw, b2_ref=b2,
        w3_ref=w3, b3_ref=b3, w4_ref=w4, b4_ref=b4,
    )


def ref_forward(x, params):
    """Pure-JAX reference mirroring the PyTorch module (eval mode), bf16 matmul
    inputs with f32 accumulation to match the kernel's numerics."""
    bf16 = jnp.bfloat16

    def conv(z, w, b):
        y = jax.lax.conv_general_dilated(
            z.astype(bf16), w.astype(bf16), window_strides=(1, 1), padding="VALID",
            dimension_numbers=("NCHW", "OIHW", "NCHW"),
            preferred_element_type=jnp.float32)
        return y + b.reshape(1, -1, 1, 1)

    def pool(z):
        n, c, h, w = z.shape
        return z.reshape(n, c, h // 2, 2, w // 2, 2).max(axis=(3, 5))

    y = jnp.maximum(pool(conv(x, params["w1_oihw"], params["b1_ref"])), 0.0)
    y = jnp.maximum(pool(conv(y, params["w2_oihw"], params["b2_ref"])), 0.0)
    y = y.reshape(x.shape[0], -1)                               # torch Flatten (c,h,w)
    h = jnp.dot(y.astype(bf16), params["w3_ref"].astype(bf16),
                preferred_element_type=jnp.float32) + params["b3_ref"]
    h = jnp.maximum(h, 0.0)
    return jnp.dot(h.astype(bf16), params["w4_ref"].astype(bf16),
                   preferred_element_type=jnp.float32) + params["b4_ref"]


if __name__ == "__main__":
    key = jax.random.PRNGKey(0)
    pkey, xkey = jax.random.split(key)
    params = init_params(pkey)
    # MNIST-shaped input: Linear(1024, 128) forces 28x28 spatial (64*4*4 = 1024).
    x = jax.random.normal(xkey, (2, 1, 28, 28), jnp.float32)

    fwd = jax.jit(mnist_cnn_forward)
    out = jax.block_until_ready(fwd(x, params))
    ref = jax.block_until_ready(jax.jit(ref_forward)(x, params))

    assert out.shape == (2, 10), out.shape
    assert jnp.allclose(out, ref, rtol=2e-2, atol=2e-2), (out, ref)
    print("KERNEL_OK")
</pallas_src>

<mosaic_0001>
module attributes {stable_mosaic.version = 11 : i64} {
  func.func @conv_pool_relu_kernel(%arg0: i32, %arg1: memref<4x144x25xbf16, #tpu.memory_space<vmem>>, %arg2: memref<25x128xbf16, #tpu.memory_space<vmem>>, %arg3: memref<1x128xf32, #tpu.memory_space<vmem>>, %arg4: memref<144x128xbf16, #tpu.memory_space<vmem>>) attributes {dimension_semantics = [#tpu.dimension_semantics<parallel>], iteration_bounds = array<i64: 2>, scalar_prefetch = 0 : i64, scratch_operands = 0 : i64, tpu.core_type = #tpu.core_type<tc>, window_params = [{transform_indices = @transform_0, window_bounds = array<i64: 4, 144, 25>}, {pipeline_mode = #tpu.pipeline_mode<synchronous>, transform_indices = @transform_1, window_bounds = array<i64: 25, 128>}, {pipeline_mode = #tpu.pipeline_mode<synchronous>, transform_indices = @transform_2, window_bounds = array<i64: 1, 128>}, {transform_indices = @transform_3, window_bounds = array<i64: 144, 128>}]} {
    %c0 = arith.constant 0 : index
    %c0_0 = arith.constant 0 : index
    %0 = vector.load %arg2[%c0, %c0_0] : memref<25x128xbf16, #tpu.memory_space<vmem>>, vector<25x128xbf16>
    %c0_1 = arith.constant 0 : index
    %c0_2 = arith.constant 0 : index
    %c0_3 = arith.constant 0 : index
    %1 = vector.load %arg1[%c0_1, %c0_2, %c0_3] : memref<4x144x25xbf16, #tpu.memory_space<vmem>>, vector<1x144x25xbf16>
    %2 = vector.shape_cast %1 : vector<1x144x25xbf16> to vector<144x25xbf16>
    %cst = arith.constant dense<0.000000e+00> : vector<144x128xf32>
    %3 = tpu.matmul %2, %0, %cst {dimension_numbers = #tpu.dot_dimension_numbers<[1], [0], [0], [1], [0, 0, 1, 1], [], []>} : vector<144x25xbf16>, vector<25x128xbf16>, vector<144x128xf32> -> vector<144x128xf32>
    %c1 = arith.constant 1 : index
    %c0_4 = arith.constant 0 : index
    %c0_5 = arith.constant 0 : index
    %4 = vector.load %arg1[%c1, %c0_4, %c0_5] : memref<4x144x25xbf16, #tpu.memory_space<vmem>>, vector<1x144x25xbf16>
    %5 = vector.shape_cast %4 : vector<1x144x25xbf16> to vector<144x25xbf16>
    %cst_6 = arith.constant dense<0.000000e+00> : vector<144x128xf32>
    %6 = tpu.matmul %5, %0, %cst_6 {dimension_numbers = #tpu.dot_dimension_numbers<[1], [0], [0], [1], [0, 0, 1, 1], [], []>} : vector<144x25xbf16>, vector<25x128xbf16>, vector<144x128xf32> -> vector<144x128xf32>
    %c2 = arith.constant 2 : index
    %c0_7 = arith.constant 0 : index
    %c0_8 = arith.constant 0 : index
    %7 = vector.load %arg1[%c2, %c0_7, %c0_8] : memref<4x144x25xbf16, #tpu.memory_space<vmem>>, vector<1x144x25xbf16>
    %8 = vector.shape_cast %7 : vector<1x144x25xbf16> to vector<144x25xbf16>
    %cst_9 = arith.constant dense<0.000000e+00> : vector<144x128xf32>
    %9 = tpu.matmul %8, %0, %cst_9 {dimension_numbers = #tpu.dot_dimension_numbers<[1], [0], [0], [1], [0, 0, 1, 1], [], []>} : vector<144x25xbf16>, vector<25x128xbf16>, vector<144x128xf32> -> vector<144x128xf32>
    %c3 = arith.constant 3 : index
    %c0_10 = arith.constant 0 : index
    %c0_11 = arith.constant 0 : index
    %10 = vector.load %arg1[%c3, %c0_10, %c0_11] : memref<4x144x25xbf16, #tpu.memory_space<vmem>>, vector<1x144x25xbf16>
    %11 = vector.shape_cast %10 : vector<1x144x25xbf16> to vector<144x25xbf16>
    %cst_12 = arith.constant dense<0.000000e+00> : vector<144x128xf32>
    %12 = tpu.matmul %11, %0, %cst_12 {dimension_numbers = #tpu.dot_dimension_numbers<[1], [0], [0], [1], [0, 0, 1, 1], [], []>} : vector<144x25xbf16>, vector<25x128xbf16>, vector<144x128xf32> -> vector<144x128xf32>
    %13 = arith.maximumf %3, %6 : vector<144x128xf32>
    %14 = arith.maximumf %9, %12 : vector<144x128xf32>
    %15 = arith.maximumf %13, %14 : vector<144x128xf32>
    %c0_13 = arith.constant 0 : index
    %c0_14 = arith.constant 0 : index
    %16 = vector.load %arg3[%c0_13, %c0_14] : memref<1x128xf32, #tpu.memory_space<vmem>>, vector<1x128xf32>
    %17 = vector.broadcast %16 : vector<1x128xf32> to vector<144x128xf32>
    %18 = arith.addf %15, %17 : vector<144x128xf32>
    %cst_15 = arith.constant 0.000000e+00 : f32
    %19 = vector.broadcast %cst_15 : f32 to vector<144x128xf32>
    %20 = arith.maximumf %18, %19 : vector<144x128xf32>
    %21 = arith.truncf %20 : vector<144x128xf32> to vector<144x128xbf16>
    %c0_16 = arith.constant 0 : index
    %c0_17 = arith.constant 0 : index
    %22 = vector.load %arg4[%c0_16, %c0_17] : memref<144x128xbf16, #tpu.memory_space<vmem>>, vector<144x128xbf16>
    tpu.vector_store %arg4[%c0_16, %c0_17], %21 {strides = array<i32>} : memref<144x128xbf16, #tpu.memory_space<vmem>>, vector<144x128xbf16>,
    return
  }
  func.func @transform_0(%arg0: i32) -> (i32, i32, i32) {
    %c0_i32 = arith.constant 0 : i32
    %c0_i32_0 = arith.constant 0 : i32
    %c0_i32_1 = arith.constant 0 : i32
    return %c0_i32, %arg0, %c0_i32_0 : i32, i32, i32
  }
  func.func @transform_1(%arg0: i32) -> (i32, i32) {
    %c0_i32 = arith.constant 0 : i32
    %c0_i32_0 = arith.constant 0 : i32
    %c0_i32_1 = arith.constant 0 : i32
    return %c0_i32, %c0_i32_0 : i32, i32
  }
  func.func @transform_2(%arg0: i32) -> (i32, i32) {
    %c0_i32 = arith.constant 0 : i32
    %c0_i32_0 = arith.constant 0 : i32
    %c0_i32_1 = arith.constant 0 : i32
    return %c0_i32, %c0_i32_0 : i32, i32
  }
  func.func @transform_3(%arg0: i32) -> (i32, i32) {
    %c0_i32 = arith.constant 0 : i32
    %c0_i32_0 = arith.constant 0 : i32
    return %arg0, %c0_i32 : i32, i32
  }
}

module attributes {stable_mosaic.version = 11 : i64} {
  func.func @conv_pool_relu_kernel(%arg0: i32, %arg1: memref<4x16x800xbf16, #tpu.memory_space<vmem>>, %arg2: memref<800x128xbf16, #tpu.memory_space<vmem>>, %arg3: memref<1x128xf32, #tpu.memory_space<vmem>>, %arg4: memref<16x128xbf16, #tpu.memory_space<vmem>>) attributes {dimension_semantics = [#tpu.dimension_semantics<parallel>], iteration_bounds = array<i64: 2>, scalar_prefetch = 0 : i64, scratch_operands = 0 : i64, tpu.core_type = #tpu.core_type<tc>, window_params = [{transform_indices = @transform_0, window_bounds = array<i64: 4, 16, 800>}, {pipeline_mode = #tpu.pipeline_mode<synchronous>, transform_indices = @transform_1, window_bounds = array<i64: 800, 128>}, {pipeline_mode = #tpu.pipeline_mode<synchronous>, transform_indices = @transform_2, window_bounds = array<i64: 1, 128>}, {transform_indices = @transform_3, window_bounds = array<i64: 16, 128>}]} {
    %c0 = arith.constant 0 : index
    %c0_0 = arith.constant 0 : index
    %0 = vector.load %arg2[%c0, %c0_0] : memref<800x128xbf16, #tpu.memory_space<vmem>>, vector<800x128xbf16>
    %c0_1 = arith.constant 0 : index
    %c0_2 = arith.constant 0 : index
    %c0_3 = arith.constant 0 : index
    %1 = vector.load %arg1[%c0_1, %c0_2, %c0_3] : memref<4x16x800xbf16, #tpu.memory_space<vmem>>, vector<1x16x800xbf16>
    %2 = vector.shape_cast %1 : vector<1x16x800xbf16> to vector<16x800xbf16>
    %cst = arith.constant dense<0.000000e+00> : vector<16x128xf32>
    %3 = tpu.matmul %2, %0, %cst {dimension_numbers = #tpu.dot_dimension_numbers<[1], [0], [0], [1], [0, 0, 1, 1], [], []>} : vector<16x800xbf16>, vector<800x128xbf16>, vector<16x128xf32> -> vector<16x128xf32>
    %c1 = arith.constant 1 : index
    %c0_4 = arith.constant 0 : index
    %c0_5 = arith.constant 0 : index
    %4 = vector.load %arg1[%c1, %c0_4, %c0_5] : memref<4x16x800xbf16, #tpu.memory_space<vmem>>, vector<1x16x800xbf16>
    %5 = vector.shape_cast %4 : vector<1x16x800xbf16> to vector<16x800xbf16>
    %cst_6 = arith.constant dense<0.000000e+00> : vector<16x128xf32>
    %6 = tpu.matmul %5, %0, %cst_6 {dimension_numbers = #tpu.dot_dimension_numbers<[1], [0], [0], [1], [0, 0, 1, 1], [], []>} : vector<16x800xbf16>, vector<800x128xbf16>, vector<16x128xf32> -> vector<16x128xf32>
    %c2 = arith.constant 2 : index
    %c0_7 = arith.constant 0 : index
    %c0_8 = arith.constant 0 : index
    %7 = vector.load %arg1[%c2, %c0_7, %c0_8] : memref<4x16x800xbf16, #tpu.memory_space<vmem>>, vector<1x16x800xbf16>
    %8 = vector.shape_cast %7 : vector<1x16x800xbf16> to vector<16x800xbf16>
    %cst_9 = arith.constant dense<0.000000e+00> : vector<16x128xf32>
    %9 = tpu.matmul %8, %0, %cst_9 {dimension_numbers = #tpu.dot_dimension_numbers<[1], [0], [0], [1], [0, 0, 1, 1], [], []>} : vector<16x800xbf16>, vector<800x128xbf16>, vector<16x128xf32> -> vector<16x128xf32>
    %c3 = arith.constant 3 : index
    %c0_10 = arith.constant 0 : index
    %c0_11 = arith.constant 0 : index
    %10 = vector.load %arg1[%c3, %c0_10, %c0_11] : memref<4x16x800xbf16, #tpu.memory_space<vmem>>, vector<1x16x800xbf16>
    %11 = vector.shape_cast %10 : vector<1x16x800xbf16> to vector<16x800xbf16>
    %cst_12 = arith.constant dense<0.000000e+00> : vector<16x128xf32>
    %12 = tpu.matmul %11, %0, %cst_12 {dimension_numbers = #tpu.dot_dimension_numbers<[1], [0], [0], [1], [0, 0, 1, 1], [], []>} : vector<16x800xbf16>, vector<800x128xbf16>, vector<16x128xf32> -> vector<16x128xf32>
    %13 = arith.maximumf %3, %6 : vector<16x128xf32>
    %14 = arith.maximumf %9, %12 : vector<16x128xf32>
    %15 = arith.maximumf %13, %14 : vector<16x128xf32>
    %c0_13 = arith.constant 0 : index
    %c0_14 = arith.constant 0 : index
    %16 = vector.load %arg3[%c0_13, %c0_14] : memref<1x128xf32, #tpu.memory_space<vmem>>, vector<1x128xf32>
    %17 = vector.broadcast %16 : vector<1x128xf32> to vector<16x128xf32>
    %18 = arith.addf %15, %17 : vector<16x128xf32>
    %cst_15 = arith.constant 0.000000e+00 : f32
    %19 = vector.broadcast %cst_15 : f32 to vector<16x128xf32>
    %20 = arith.maximumf %18, %19 : vector<16x128xf32>
    %21 = arith.truncf %20 : vector<16x128xf32> to vector<16x128xbf16>
    %c0_16 = arith.constant 0 : index
    %c0_17 = arith.constant 0 : index
    %22 = vector.load %arg4[%c0_16, %c0_17] : memref<16x128xbf16, #tpu.memory_space<vmem>>, vector<16x128xbf16>
    tpu.vector_store %arg4[%c0_16, %c0_17], %21 {strides = array<i32>} : memref<16x128xbf16, #tpu.memory_space<vmem>>, vector<16x128xbf16>,
    return
  }
  func.func @transform_0(%arg0: i32) -> (i32, i32, i32) {
    %c0_i32 = arith.constant 0 : i32
    %c0_i32_0 = arith.constant 0 : i32
    %c0_i32_1 = arith.constant 0 : i32
    return %c0_i32, %arg0, %c0_i32_0 : i32, i32, i32
  }
  func.func @transform_1(%arg0: i32) -> (i32, i32) {
    %c0_i32 = arith.constant 0 : i32
    %c0_i32_0 = arith.constant 0 : i32
    %c0_i32_1 = arith.constant 0 : i32
    return %c0_i32, %c0_i32_0 : i32, i32
  }
  func.func @transform_2(%arg0: i32) -> (i32, i32) {
    %c0_i32 = arith.constant 0 : i32
    %c0_i32_0 = arith.constant 0 : i32
    %c0_i32_1 = arith.constant 0 : i32
    return %c0_i32, %c0_i32_0 : i32, i32
  }
  func.func @transform_3(%arg0: i32) -> (i32, i32) {
    %c0_i32 = arith.constant 0 : i32
    %c0_i32_0 = arith.constant 0 : i32
    return %arg0, %c0_i32 : i32, i32
  }
}

module attributes {stable_mosaic.version = 11 : i64} {
  func.func @mlp_head_kernel(%arg0: i32, %arg1: memref<16x2048xbf16, #tpu.memory_space<vmem>>, %arg2: memref<2048x128xbf16, #tpu.memory_space<vmem>>, %arg3: memref<1x128xf32, #tpu.memory_space<vmem>>, %arg4: memref<128x128xbf16, #tpu.memory_space<vmem>>, %arg5: memref<1x128xf32, #tpu.memory_space<vmem>>, %arg6: memref<16x128xf32, #tpu.memory_space<vmem>>) attributes {dimension_semantics = [#tpu.dimension_semantics<parallel>], iteration_bounds = array<i64: 1>, scalar_prefetch = 0 : i64, scratch_operands = 0 : i64, tpu.core_type = #tpu.core_type<tc>, window_params = [{transform_indices = @transform_0, window_bounds = array<i64: 16, 2048>}, {pipeline_mode = #tpu.pipeline_mode<synchronous>, transform_indices = @transform_1, window_bounds = array<i64: 2048, 128>}, {pipeline_mode = #tpu.pipeline_mode<synchronous>, transform_indices = @transform_2, window_bounds = array<i64: 1, 128>}, {pipeline_mode = #tpu.pipeline_mode<synchronous>, transform_indices = @transform_3, window_bounds = array<i64: 128, 128>}, {pipeline_mode = #tpu.pipeline_mode<synchronous>, transform_indices = @transform_4, window_bounds = array<i64: 1, 128>}, {transform_indices = @transform_5, window_bounds = array<i64: 16, 128>}]} {
    %c0 = arith.constant 0 : index
    %c0_0 = arith.constant 0 : index
    %0 = vector.load %arg1[%c0, %c0_0] : memref<16x2048xbf16, #tpu.memory_space<vmem>>, vector<16x2048xbf16>
    %c0_1 = arith.constant 0 : index
    %c0_2 = arith.constant 0 : index
    %1 = vector.load %arg2[%c0_1, %c0_2] : memref<2048x128xbf16, #tpu.memory_space<vmem>>, vector<2048x128xbf16>
    %cst = arith.constant dense<0.000000e+00> : vector<16x128xf32>
    %2 = tpu.matmul %0, %1, %cst {dimension_numbers = #tpu.dot_dimension_numbers<[1], [0], [0], [1], [0, 0, 1, 1], [], []>} : vector<16x2048xbf16>, vector<2048x128xbf16>, vector<16x128xf32> -> vector<16x128xf32>
    %c0_3 = arith.constant 0 : index
    %c0_4 = arith.constant 0 : index
    %3 = vector.load %arg3[%c0_3, %c0_4] : memref<1x128xf32, #tpu.memory_space<vmem>>, vector<1x128xf32>
    %4 = vector.broadcast %3 : vector<1x128xf32> to vector<16x128xf32>
    %5 = arith.addf %2, %4 : vector<16x128xf32>
    %cst_5 = arith.constant 0.000000e+00 : f32
    %6 = vector.broadcast %cst_5 : f32 to vector<16x128xf32>
    %7 = arith.maximumf %5, %6 : vector<16x128xf32>
    %8 = arith.truncf %7 : vector<16x128xf32> to vector<16x128xbf16>
    %c0_6 = arith.constant 0 : index
    %c0_7 = arith.constant 0 : index
    %9 = vector.load %arg4[%c0_6, %c0_7] : memref<128x128xbf16, #tpu.memory_space<vmem>>, vector<128x128xbf16>
    %cst_8 = arith.constant dense<0.000000e+00> : vector<16x128xf32>
    %10 = tpu.matmul %8, %9, %cst_8 {dimension_numbers = #tpu.dot_dimension_numbers<[1], [0], [0], [1], [0, 0, 1, 1], [], []>} : vector<16x128xbf16>, vector<128x128xbf16>, vector<16x128xf32> -> vector<16x128xf32>
    %c0_9 = arith.constant 0 : index
    %c0_10 = arith.constant 0 : index
    %11 = vector.load %arg5[%c0_9, %c0_10] : memref<1x128xf32, #tpu.memory_space<vmem>>, vector<1x128xf32>
    %12 = vector.broadcast %11 : vector<1x128xf32> to vector<16x128xf32>
    %13 = arith.addf %10, %12 : vector<16x128xf32>
    %c0_11 = arith.constant 0 : index
    %c0_12 = arith.constant 0 : index
    %14 = vector.load %arg6[%c0_11, %c0_12] : memref<16x128xf32, #tpu.memory_space<vmem>>, vector<16x128xf32>
    tpu.vector_store %arg6[%c0_11, %c0_12], %13 {strides = array<i32>} : memref<16x128xf32, #tpu.memory_space<vmem>>, vector<16x128xf32>,
    return
  }
  func.func @transform_0(%arg0: i32) -> (i32, i32) {
    %c0_i32 = arith.constant 0 : i32
    %c0_i32_0 = arith.constant 0 : i32
    return %arg0, %c0_i32 : i32, i32
  }
  func.func @transform_1(%arg0: i32) -> (i32, i32) {
    %c0_i32 = arith.constant 0 : i32
    %c0_i32_0 = arith.constant 0 : i32
    %c0_i32_1 = arith.constant 0 : i32
    return %c0_i32, %c0_i32_0 : i32, i32
  }
  func.func @transform_2(%arg0: i32) -> (i32, i32) {
    %c0_i32 = arith.constant 0 : i32
    %c0_i32_0 = arith.constant 0 : i32
    %c0_i32_1 = arith.constant 0 : i32
    return %c0_i32, %c0_i32_0 : i32, i32
  }
  func.func @transform_3(%arg0: i32) -> (i32, i32) {
    %c0_i32 = arith.constant 0 : i32
    %c0_i32_0 = arith.constant 0 : i32
    %c0_i32_1 = arith.constant 0 : i32
    return %c0_i32, %c0_i32_0 : i32, i32
  }
  func.func @transform_4(%arg0: i32) -> (i32, i32) {
    %c0_i32 = arith.constant 0 : i32
    %c0_i32_0 = arith.constant 0 : i32
    %c0_i32_1 = arith.constant 0 : i32
    return %c0_i32, %c0_i32_0 : i32, i32
  }
  func.func @transform_5(%arg0: i32) -> (i32, i32) {
    %c0_i32 = arith.constant 0 : i32
    %c0_i32_0 = arith.constant 0 : i32
    return %arg0, %c0_i32 : i32, i32
  }
}

</mosaic_0001>

<bundles_post_ra>
// kernel: mnist_cnn_forward.3
= control target key start
LH: loop header
LB: loop body
LE: loop exit
PB: predicated region body
PF: predicated region fallthrough
CT: control target
= control target key end

     0   :  { %s1712_s12 = smov 0   ;;  %s1714_s13 = smov 0   ;;  %s1957_s0 = inlined_call_operand.vmem [shape: bf16[4,288,25], index: 0, kind: input, shape index: {}]   ;;  %s1958_s1 = inlined_call_operand.vmem [shape: bf16[25,128], index: 1, kind: input, shape index: {}]   ;;  %s1959_s2 = inlined_call_operand.vmem [shape: f32[1,128], index: 2, kind: input, shape index: {}]   ;;  %s1960_s3 = inlined_call_operand.vmem [shape: bf16[288,128], index: 3, kind: output, shape index: {}]  }
   0x1   :  { %s1716_s14 = smov 0  }
   0x2 LB: > { %s1296_s15 = sadd.s32 4294967295, %s1689_s14   ;;  %s1729_s16 = sadd.s32 1, %s1689_s14   ;;  %s1689_s14 = sphi %s1716_s14, %s1963_s14   ;;  %s1685_s13 = sphi %s1714_s13, %s1962_s13   ;;  %s1681_s12 = sphi %s1712_s12, %s1961_s12  }
   0x3   : > { %s17_s17 = ssub.s32 %s1689_s14, %s1729_s16  ;;  %s20_s18 = sadd.s32 1, %s1685_s13 }
   0x4   : > { %p18_p0 = scmp.eq.s32.totalorder %s17_s17, 0  ;;  %p27_p1 = scmp.ne.s32.totalorder %s1685_s13, %s1681_s12 }
   0x5   : > { %p28_p2 = scmp.eq.s32.totalorder %s1689_s14, 0  ;;  %p1299_p4 = scmp.ge.s32.totalorder %s1689_s14, 2 }
   0x6   : > { %s1738_s19 = scalar_select %p18_p0, %s1685_s13, %s20_s18  }
   0x7   : > { %p29_p3 = por %p28_p2, %p27_p1  ;;  %127 = sbr.rel (%p1299_p4) target bundleno = 53 (0x35), region = 24 }
   0xc   : > { %130 = sbr.rel (!%p29_p3) target bundleno = 53 (0x35), region = 28  ;;  %s132_s20 = sand.u32 (%p29_p3), 1, %s1685_s13  }
   0xd   : > { %s1547_s21 = smul.u32 (%p29_p3), 72, %s1689_s14 }
   0xe   : > { %s1639_s22 = smul.u32 (%p29_p3), 288, %s132_s20 }
   0xf   : > { %s1746_s25 = scalar_lea.vmem (%p29_p3), %s1957_s0, %s1547_s21 }
  0x10   : > { %v154_v0 = vld [vmem:[%s1746_s25] sm:$0xff] (%p29_p3)   ;;  %v158_v1 = vld [vmem:[%s1746_s25 + $0x8] sm:$0xff] (%p29_p3)   ;;  %v162_v2 = vld [vmem:[%s1746_s25 + $0x10] sm:$0xff] (%p29_p3)   ;;  %s1751_s26 = scalar_lea.vmem (%p29_p3), [#allocation2], %s1639_s22 }
  0x11   : > { %155 = vst [vmem:[%s1751_s26] sm:$0xff] %v154_v0   ;;  %v166_v3 = vld [vmem:[%s1746_s25 + $0x18] sm:$0xff]   ;;  %v170_v4 = vld [vmem:[%s1746_s25 + $0x20] sm:$0xff]   ;;  %v174_v5 = vld [vmem:[%s1746_s25 + $0x28] sm:$0xff]  }
  0x12   : > { %159 = vst [vmem:[%s1751_s26 + $0x8] sm:$0xff] %v158_v1   ;;  %v178_v6 = vld [vmem:[%s1746_s25 + $0x30] sm:$0xff]   ;;  %v182_v7 = vld [vmem:[%s1746_s25 + $0x38] sm:$0xff]   ;;  %v186_v8 = vld [vmem:[%s1746_s25 + $0x40] sm:$0xff]  }
  0x13   : > { %163 = vst [vmem:[%s1751_s26 + $0x10] sm:$0xff] %v162_v2   ;;  %v190_v9 = vld [vmem:[%s1746_s25 + $0x90] sm:$0xff]   ;;  %v194_v10 = vld [vmem:[%s1746_s25 + $0x98] sm:$0xff]   ;;  %v198_v11 = vld [vmem:[%s1746_s25 + $0xa0] sm:$0xff]  }
  0x14   : > { %167 = vst [vmem:[%s1751_s26 + $0x18] sm:$0xff] %v166_v3   ;;  %v202_v12 = vld [vmem:[%s1746_s25 + $0xa8] sm:$0xff]   ;;  %v206_v13 = vld [vmem:[%s1746_s25 + $0xb0] sm:$0xff]   ;;  %v210_v14 = vld [vmem:[%s1746_s25 + $0xb8] sm:$0xff]  }
  0x15   : > { %171 = vst [vmem:[%s1751_s26 + $0x20] sm:$0xff] %v170_v4   ;;  %v214_v15 = vld [vmem:[%s1746_s25 + $0xc0] sm:$0xff]   ;;  %v218_v16 = vld [vmem:[%s1746_s25 + $0xc8] sm:$0xff]   ;;  %v222_v17 = vld [vmem:[%s1746_s25 + $0xd0] sm:$0xff]  }
  0x16   : > { %175 = vst [vmem:[%s1751_s26 + $0x28] sm:$0xff] %v174_v5   ;;  %v226_v18 = vld [vmem:[%s1746_s25 + $0x120] sm:$0xff]   ;;  %v230_v19 = vld [vmem:[%s1746_s25 + $0x128] sm:$0xff]   ;;  %v234_v20 = vld [vmem:[%s1746_s25 + $0x130] sm:$0xff]  }
  0x17   : > { %179 = vst [vmem:[%s1751_s26 + $0x30] sm:$0xff] %v178_v6   ;;  %v238_v21 = vld [vmem:[%s1746_s25 + $0x138] sm:$0xff]   ;;  %v242_v22 = vld [vmem:[%s1746_s25 + $0x140] sm:$0xff]   ;;  %v246_v23 = vld [vmem:[%s1746_s25 + $0x148] sm:$0xff]  }
  0x18   : > { %183 = vst [vmem:[%s1751_s26 + $0x38] sm:$0xff] %v182_v7   ;;  %v250_v24 = vld [vmem:[%s1746_s25 + $0x150] sm:$0xff]   ;;  %v254_v25 = vld [vmem:[%s1746_s25 + $0x158] sm:$0xff]   ;;  %v258_v26 = vld [vmem:[%s1746_s25 + $0x160] sm:$0xff]  }
  0x19   : > { %187 = vst [vmem:[%s1751_s26 + $0x40] sm:$0xff] %v186_v8   ;;  %v262_v27 = vld [vmem:[%s1746_s25 + $0x1b0] sm:$0xff]   ;;  %v266_v28 = vld [vmem:[%s1746_s25 + $0x1b8] sm:$0xff]   ;;  %v270_v29 = vld [vmem:[%s1746_s25 + $0x1c0] sm:$0xff]  }
  0x1a   : > { %191 = vst [vmem:[%s1751_s26 + $0x48] sm:$0xff] %v190_v9   ;;  %v274_v30 = vld [vmem:[%s1746_s25 + $0x1c8] sm:$0xff]   ;;  %v278_v31 = vld [vmem:[%s1746_s25 + $0x1d0] sm:$0xff]   ;;  %v282_v32 = vld [vmem:[%s1746_s25 + $0x1d8] sm:$0xff]  }
  0x1b   : > { %195 = vst [vmem:[%s1751_s26 + $0x50] sm:$0xff] %v194_v10   ;;  %v286_v33 = vld [vmem:[%s1746_s25 + $0x1e0] sm:$0xff]   ;;  %v290_v34 = vld [vmem:[%s1746_s25 + $0x1e8] sm:$0xff]   ;;  %v294_v35 = vld [vmem:[%s1746_s25 + $0x1f0] sm:$0xff]  }
  0x1c   : > { %199 = vst [vmem:[%s1751_s26 + $0x58] sm:$0xff] %v198_v11  }
  0x1d   : > { %203 = vst [vmem:[%s1751_s26 + $0x60] sm:$0xff] %v202_v12  }
  0x1e   : > { %207 = vst [vmem:[%s1751_s26 + $0x68] sm:$0xff] %v206_v13  }
  0x1f   : > { %211 = vst [vmem:[%s1751_s26 + $0x70] sm:$0xff] %v210_v14  }
  0x20   : > { %215 = vst [vmem:[%s1751_s26 + $0x78] sm:$0xff] %v214_v15  }
  0x21   : > { %219 = vst [vmem:[%s1751_s26 + $0x80] sm:$0xff] %v218_v16  }
  0x22   : > { %223 = vst [vmem:[%s1751_s26 + $0x88] sm:$0xff] %v222_v17  }
  0x23   : > { %227 = vst [vmem:[%s1751_s26 + $0x90] sm:$0xff] %v226_v18  }
  0x24   : > { %231 = vst [vmem:[%s1751_s26 + $0x98] sm:$0xff] %v230_v19  }
  0x25   : > { %235 = vst [vmem:[%s1751_s26 + $0xa0] sm:$0xff] %v234_v20  }
  0x26   : > { %239 = vst [vmem:[%s1751_s26 + $0xa8] sm:$0xff] %v238_v21  }
  0x27   : > { %243 = vst [vmem:[%s1751_s26 + $0xb0] sm:$0xff] %v242_v22  }
  0x28   : > { %247 = vst [vmem:[%s1751_s26 + $0xb8] sm:$0xff] %v246_v23  }
  0x29   : > { %251 = vst [vmem:[%s1751_s26 + $0xc0] sm:$0xff] %v250_v24  }
  0x2a   : > { %255 = vst [vmem:[%s1751_s26 + $0xc8] sm:$0xff] %v254_v25  }
  0x2b   : > { %259 = vst [vmem:[%s1751_s26 + $0xd0] sm:$0xff] %v258_v26  }
  0x2c   : > { %263 = vst [vmem:[%s1751_s26 + $0xd8] sm:$0xff] %v262_v27  }
  0x2d   : > { %267 = vst [vmem:[%s1751_s26 + $0xe0] sm:$0xff] %v266_v28  }
  0x2e   : > { %271 = vst [vmem:[%s1751_s26 + $0xe8] sm:$0xff] %v270_v29  }
  0x2f   : > { %275 = vst [vmem:[%s1751_s26 + $0xf0] sm:$0xff] %v274_v30  }
  0x30   : > { %279 = vst [vmem:[%s1751_s26 + $0xf8] sm:$0xff] %v278_v31  }
  0x31   : > { %283 = vst [vmem:[%s1751_s26 + $0x100] sm:$0xff] %v282_v32  }
  0x32   : > { %287 = vst [vmem:[%s1751_s26 + $0x108] sm:$0xff] %v286_v33  }
  0x33   : > { %291 = vst [vmem:[%s1751_s26 + $0x110] sm:$0xff] %v290_v34  }
  0x34   : > { %295 = vst [vmem:[%s1751_s26 + $0x118] sm:$0xff] %v294_v35  }
  0x35 PF: > { %p1301_p5 = scmp.ge.s32.totalorder %s1689_s14, 1  ;;  %p464_p6 = scmp.lt.s32.totalorder %s1689_s14, 3 }
  0x37   : > { %p465_p7 = pnand %p1301_p5, %p464_p6 }
  0x38   : > { %s471_s4 = sand.u32 (!%p465_p7), 1, %s1681_s12   ;;  %s495_s9 = smul.u32 (!%p465_p7), 18, %s1296_s15 }
  0x39   : > { %468 = sbr.rel (%p465_p7) target bundleno = 355 (0x163), region = 69 }
  0x3a   : > { %s1640_s5 = smul.u32 (!%p465_p7), 288, %s471_s4  ;;  %p496_p8 = scmp.lt.s32.totalorder (!%p465_p7), %s495_s9, 35 }
  0x3c   : > { %s1834_s8 = scalar_lea.vmem (!%p465_p7), [#allocation2], %s1640_s5 }
  0x3e   : > { %v1345_v36 = vld [vmem:[%s1958_s1 + $0x8] sm:$0xf]  ;;  %v1549_v37 = vld [vmem:[%s1958_s1 + $0x8] sm:$0x10]  ;;  %vm608_vm0 = vcmask 1043456   ;;  %vm609_vm1 = vcmask 1044480  }
  0x3f   : > { %v1346_v38 = vor.u32 %v1549_v37, %v1345_v36  ;;  %v1691_v39 = vmov 65535   ;;  %v1548_v43 = vld [vmem:[%s1958_s1] sm:$0xff]  ;;  %v1559_v45 = vld [vmem:[%s1834_s8 + $0x48] sm:$0xff]  ;;  %vm580_vm2 = vcmask 203776   ;;  %v1568_v46 = vld [vmem:[%s1834_s8 + $0x90] sm:$0xff]  ;;  %s1965_s9 = smov (!%p496_p8, %s495_s9), 35 }
  0x40   : > { %v610_v40 = vsel %vm608_vm0, 4294967295, %v1691_v39  ;;  %v1550_v44 = vld [vmem:[%s1834_s8] sm:$0xff]  ;;  %v1577_v47 = vld [vmem:[%s1834_s8 + $0xd8] sm:$0xff]  ;;  %v1551_v48 = vld [vmem:[%s1834_s8 + $0x8] sm:$0xff]  ;;  %s1302_s12 = sshll.u32 %s1965_s9, 2 }
  0x41   : > { %v611_v41 = vsel %vm609_vm1, %v610_v40, 0  ;;  %v1560_v49 = vld [vmem:[%s1834_s8 + $0x50] sm:$0xff]  ;;  %v1569_v50 = vld [vmem:[%s1834_s8 + $0x98] sm:$0xff]  ;;  %v1578_v51 = vld [vmem:[%s1834_s8 + $0xe0] sm:$0xff]  ;;  %s1920_s17 = scalar_lea.vmem %s1960_s3, %s1302_s12 }
  0x42   : > { %v613_v42 = vand.u32 %v1346_v38, %v611_v41  ;;  %v1552_v52 = vld [vmem:[%s1834_s8 + $0x10] sm:$0xff]  ;;  %v1561_v53 = vld [vmem:[%s1834_s8 + $0x58] sm:$0xff]  ;;  %v1570_v54 = vld [vmem:[%s1834_s8 + $0xa0] sm:$0xff] }
  0x43   : > { %v1579_v55 = vld [vmem:[%s1834_s8 + $0xe8] sm:$0xff]  ;;  %v1553_v56 = vld [vmem:[%s1834_s8 + $0x18] sm:$0xff]  ;;  %v1562_v57 = vld [vmem:[%s1834_s8 + $0x60] sm:$0xff] }
  0x44   : > { %621 = vmatpush.bf16.msra.mxu0 %v613_v42  ;;  %766 = vmatpush.bf16.msra.mxu1 %v613_v42  ;;  %v1571_v58 = vld [vmem:[%s1834_s8 + $0xa8] sm:$0xff]  ;;  %v1580_v59 = vld [vmem:[%s1834_s8 + $0xf0] sm:$0xff]  ;;  %v1554_v60 = vld [vmem:[%s1834_s8 + $0x20] sm:$0xff] }
  0x45   : > { %911 = vmatpush.bf16.msra.mxu2 %v613_v42  ;;  %1056 = vmatpush.bf16.msra.mxu3 %v613_v42  ;;  %v1563_v61 = vld [vmem:[%s1834_s8 + $0x68] sm:$0xff]  ;;  %v1572_v62 = vld [vmem:[%s1834_s8 + $0xb0] sm:$0xff]  ;;  %v1581_v63 = vld [vmem:[%s1834_s8 + $0xf8] sm:$0xff] }
  0x46   : > { %v1555_v0 = vld [vmem:[%s1834_s8 + $0x28] sm:$0xff]  ;;  %v1564_v1 = vld [vmem:[%s1834_s8 + $0x70] sm:$0xff]  ;;  %v1573_v2 = vld [vmem:[%s1834_s8 + $0xb8] sm:$0xff] }
  0x47   : > { %v1582_v3 = vld [vmem:[%s1834_s8 + $0x100] sm:$0xff]  ;;  %v1556_v4 = vld [vmem:[%s1834_s8 + $0x30] sm:$0xff]  ;;  %v1565_v5 = vld [vmem:[%s1834_s8 + $0x78] sm:$0xff] }
  0x48   : > { %622 = vmatpush.bf16.msra.mxu0 %v1548_v43  ;;  %767 = vmatpush.bf16.msra.mxu1 %v1548_v43  ;;  %v1574_v6 = vld [vmem:[%s1834_s8 + $0xc0] sm:$0xff]  ;;  %v1583_v7 = vld [vmem:[%s1834_s8 + $0x108] sm:$0xff]  ;;  %v1557_v8 = vld [vmem:[%s1834_s8 + $0x38] sm:$0xff] }
  0x49   : > { %912 = vmatpush.bf16.msra.mxu2 %v1548_v43  ;;  %1057 = vmatpush.bf16.msra.mxu3 %v1548_v43  ;;  %v1566_v9 = vld [vmem:[%s1834_s8 + $0x80] sm:$0xff]  ;;  %v1575_v10 = vld [vmem:[%s1834_s8 + $0xc8] sm:$0xff]  ;;  %v1584_v11 = vld [vmem:[%s1834_s8 + $0x110] sm:$0xff] }
  0x4a   : > { %v1558_v12 = vld [vmem:[%s1834_s8 + $0x40] sm:$0xff]  ;;  %v1567_v13 = vld [vmem:[%s1834_s8 + $0x88] sm:$0xff]  ;;  %v1576_v16 = vld [vmem:[%s1834_s8 + $0xd0] sm:$0xff] }
  0x4b   : > { %1347 = vmatmul.msk.bf16.vlgmr.msra.gmra.mxu0 %vm580_vm2, %v1550_v44  ;;  %1410 = vmatmul.msk.bf16.vlgmr.msra.gmra.mxu1 %vm580_vm2, %v1559_v45  ;;  %v1585_v17 = vld [vmem:[%s1834_s8 + $0x118] sm:$0xff]  ;;  %v1913_v25 = vld [vmem:[%s1959_s2] ss:$0 sm:$0xff] }
  0x4c   : > { %1473 = vmatmul.msk.bf16.vlgmr.msra.gmra.mxu2 %vm580_vm2, %v1568_v46  ;;  %1536 = vmatmul.msk.bf16.vlgmr.msra.gmra.mxu3 %vm580_vm2, %v1577_v47 }
  0x5b   : > { %1348 = vmatmul.msk.bf16.gmra.mxu0 %vm580_vm2, %v1551_v48  ;;  %1411 = vmatmul.msk.bf16.gmra.mxu1 %vm580_vm2, %v1560_v49 }
  0x5c   : > { %1474 = vmatmul.msk.bf16.gmra.mxu2 %vm580_vm2, %v1569_v50  ;;  %1537 = vmatmul.msk.bf16.gmra.mxu3 %vm580_vm2, %v1578_v51 }
  0x6b   : > { %1349 = vmatmul.msk.bf16.gmra.mxu0 %vm580_vm2, %v1552_v52  ;;  %1412 = vmatmul.msk.bf16.gmra.mxu1 %vm580_vm2, %v1561_v53 }
  0x6c   : > { %1475 = vmatmul.msk.bf16.gmra.mxu2 %vm580_vm2, %v1570_v54  ;;  %1538 = vmatmul.msk.bf16.gmra.mxu3 %vm580_vm2, %v1579_v55 }
  0x7b   : > { %1350 = vmatmul.msk.bf16.gmra.mxu0 %vm580_vm2, %v1553_v56  ;;  %1413 = vmatmul.msk.bf16.gmra.mxu1 %vm580_vm2, %v1562_v57 }
  0x7c   : > { %1476 = vmatmul.msk.bf16.gmra.mxu2 %vm580_vm2, %v1571_v58  ;;  %1539 = vmatmul.msk.bf16.gmra.mxu3 %vm580_vm2, %v1580_v59 }
  0x8b   : > { %1351 = vmatmul.msk.bf16.gmra.mxu0 %vm580_vm2, %v1554_v60  ;;  %1414 = vmatmul.msk.bf16.gmra.mxu1 %vm580_vm2, %v1563_v61 }
  0x8c   : > { %1477 = vmatmul.msk.bf16.gmra.mxu2 %vm580_vm2, %v1572_v62  ;;  %1540 = vmatmul.msk.bf16.gmra.mxu3 %vm580_vm2, %v1581_v63 }
  0x9b   : > { %1352 = vmatmul.msk.bf16.gmra.mxu0 %vm580_vm2, %v1555_v0  ;;  %1415 = vmatmul.msk.bf16.gmra.mxu1 %vm580_vm2, %v1564_v1 }
  0x9c   : > { %1478 = vmatmul.msk.bf16.gmra.mxu2 %vm580_vm2, %v1573_v2  ;;  %1541 = vmatmul.msk.bf16.gmra.mxu3 %vm580_vm2, %v1582_v3 }
  0xab   : > { %1353 = vmatmul.msk.bf16.gmra.mxu0 %vm580_vm2, %v1556_v4  ;;  %1416 = vmatmul.msk.bf16.gmra.mxu1 %vm580_vm2, %v1565_v5 }
  0xac   : > { %1479 = vmatmul.msk.bf16.gmra.mxu2 %vm580_vm2, %v1574_v6  ;;  %1542 = vmatmul.msk.bf16.gmra.mxu3 %vm580_vm2, %v1583_v7 }
  0xbb   : > { %1354 = vmatmul.msk.bf16.gmra.mxu0 %vm580_vm2, %v1557_v8  ;;  %1417 = vmatmul.msk.bf16.gmra.mxu1 %vm580_vm2, %v1566_v9 }
  0xbc   : > { %1480 = vmatmul.msk.bf16.gmra.mxu2 %vm580_vm2, %v1575_v10  ;;  %1543 = vmatmul.msk.bf16.gmra.mxu3 %vm580_vm2, %v1584_v11 }
  0xc8   : > { %v624_v14 = vpop.f32.mrf.mxu0  ;;  %v769_v15 = vpop.f32.mrf.mxu1 }
  0xc9   : > { %v1104_v22 = vmax.f32 %v624_v14, %v769_v15 }
  0xcb   : > { %1355 = vmatmul.msk.bf16.gmra.mxu0 %vm580_vm2, %v1558_v12  ;;  %1418 = vmatmul.msk.bf16.gmra.mxu1 %vm580_vm2, %v1567_v13 }
  0xcc   : > { %1481 = vmatmul.msk.bf16.gmra.mxu2 %vm580_vm2, %v1576_v16  ;;  %1544 = vmatmul.msk.bf16.gmra.mxu3 %vm580_vm2, %v1585_v17 }
  0xcf   : > { %v914_v18 = vpop.f32.mrf.mxu2  ;;  %v1059_v19 = vpop.f32.mrf.mxu3 }
  0xd0   : > { %v626_v20 = vpop.f32.mrf.mxu0  ;;  %v771_v21 = vpop.f32.mrf.mxu1  ;;  %v1122_v23 = vmax.f32 %v914_v18, %v1059_v19 }
  0xd1   : > { %v1105_v28 = vmax.f32 %v626_v20, %v771_v21 }
  0xd2   : > { %v1140_v24 = vmax.f32 %v1104_v22, %v1122_v23 }
  0xd4   : > { %v1162_v32 = vadd.f32 %v1913_v25, %v1140_v24 }
  0xd6   : > { %v1180_v35 = vmax.f32 %v1162_v32, 0.0 }
  0xd7   : > { %v916_v26 = vpop.f32.mrf.mxu2  ;;  %v1061_v27 = vpop.f32.mrf.mxu3 }
  0xd8   : > { %v1123_v29 = vmax.f32 %v916_v26, %v1061_v27  ;;  %v629_v30 = vpop.f32.mrf.mxu0  ;;  %v774_v31 = vpop.f32.mrf.mxu1 }
  0xd9   : > { %v1106_v42 = vmax.f32 %v629_v30, %v774_v31 }
  0xda   : > { %v1141_v33 = vmax.f32 %v1105_v28, %v1123_v29 }
  0xdc   : > { %v1163_v34 = vadd.f32 %v1913_v25, %v1141_v33 }
  0xde   : > { %v1181_v36 = vmax.f32 %v1163_v34, 0.0 }
  0xdf   : > { %v919_v37 = vpop.f32.mrf.mxu2  ;;  %v1064_v38 = vpop.f32.mrf.mxu3 }
  0xe0   : > { %v1589_v39 = vpack.c.bf16 %v1181_v36, %v1180_v35  ;;  %v631_v40 = vpop.f32.mrf.mxu0  ;;  %v776_v41 = vpop.f32.mrf.mxu1  ;;  %v1124_v43 = vmax.f32 %v919_v37, %v1064_v38 }
  0xe1   : > { %v1107_v47 = vmax.f32 %v631_v40, %v776_v41 }
  0xe2   : > { %1590 = vst [vmem:[%s1920_s17] sm:$0xff] %v1589_v39   ;;  %v1142_v44 = vmax.f32 %v1106_v42, %v1124_v43 }
  0xe4   : > { %v1164_v51 = vadd.f32 %v1913_v25, %v1142_v44 }
  0xe6   : > { %v1182_v54 = vmax.f32 %v1164_v51, 0.0 }
  0xe7   : > { %v921_v45 = vpop.f32.mrf.mxu2  ;;  %v1066_v46 = vpop.f32.mrf.mxu3 }
  0xe8   : > { %v1125_v48 = vmax.f32 %v921_v45, %v1066_v46  ;;  %v634_v49 = vpop.f32.mrf.mxu0  ;;  %v779_v50 = vpop.f32.mrf.mxu1 }
  0xe9   : > { %v1108_v61 = vmax.f32 %v634_v49, %v779_v50 }
  0xea   : > { %v1143_v52 = vmax.f32 %v1107_v47, %v1125_v48 }
  0xec   : > { %v1165_v53 = vadd.f32 %v1913_v25, %v1143_v52 }
  0xee   : > { %v1183_v55 = vmax.f32 %v1165_v53, 0.0 }
  0xef   : > { %v924_v56 = vpop.f32.mrf.mxu2  ;;  %v1069_v57 = vpop.f32.mrf.mxu3 }
  0xf0   : > { %v1594_v58 = vpack.c.bf16 %v1183_v55, %v1182_v54  ;;  %v636_v59 = vpop.f32.mrf.mxu0  ;;  %v781_v60 = vpop.f32.mrf.mxu1  ;;  %v1126_v62 = vmax.f32 %v924_v56, %v1069_v57 }
  0xf1   : > { %v1109_v2 = vmax.f32 %v636_v59, %v781_v60 }
  0xf2   : > { %1631 = vst [vmem:[%s1920_s17 + $0x8] sm:$0xff] %v1594_v58   ;;  %v1144_v63 = vmax.f32 %v1108_v61, %v1126_v62 }
  0xf4   : > { %v1166_v6 = vadd.f32 %v1913_v25, %v1144_v63 }
  0xf6   : > { %v1184_v9 = vmax.f32 %v1166_v6, 0.0 }
  0xf7   : > { %v926_v0 = vpop.f32.mrf.mxu2  ;;  %v1071_v1 = vpop.f32.mrf.mxu3 }
  0xf8   : > { %v1127_v3 = vmax.f32 %v926_v0, %v1071_v1  ;;  %v639_v4 = vpop.f32.mrf.mxu0  ;;  %v784_v5 = vpop.f32.mrf.mxu1 }
  0xf9   : > { %v1110_v16 = vmax.f32 %v639_v4, %v784_v5 }
  0xfa   : > { %v1145_v7 = vmax.f32 %v1109_v2, %v1127_v3 }
  0xfc   : > { %v1167_v8 = vadd.f32 %v1913_v25, %v1145_v7 }
  0xfe   : > { %v1185_v10 = vmax.f32 %v1167_v8, 0.0 }
  0xff   : > { %v929_v11 = vpop.f32.mrf.mxu2  ;;  %v1074_v12 = vpop.f32.mrf.mxu3 }
 0x100   : > { %v1599_v13 = vpack.c.bf16 %v1185_v10, %v1184_v9  ;;  %v641_v14 = vpop.f32.mrf.mxu0  ;;  %v786_v15 = vpop.f32.mrf.mxu1  ;;  %v1128_v17 = vmax.f32 %v929_v11, %v1074_v12 }
 0x101   : > { %v1111_v21 = vmax.f32 %v641_v14, %v786_v15 }
 0x102   : > { %1632 = vst [vmem:[%s1920_s17 + $0x10] sm:$0xff] %v1599_v13   ;;  %v1146_v18 = vmax.f32 %v1110_v16, %v1128_v17 }
 0x104   : > { %v1168_v26 = vadd.f32 %v1913_v25, %v1146_v18 }
 0x106   : > { %v1186_v29 = vmax.f32 %v1168_v26, 0.0 }
 0x107   : > { %v931_v19 = vpop.f32.mrf.mxu2  ;;  %v1076_v20 = vpop.f32.mrf.mxu3 }
 0x108   : > { %v1129_v22 = vmax.f32 %v931_v19, %v1076_v20  ;;  %v644_v23 = vpop.f32.mrf.mxu0  ;;  %v789_v24 = vpop.f32.mrf.mxu1 }
 0x109   : > { %v1112_v36 = vmax.f32 %v644_v23, %v789_v24 }
 0x10a   : > { %v1147_v27 = vmax.f32 %v1111_v21, %v1129_v22 }
 0x10c   : > { %v1169_v28 = vadd.f32 %v1913_v25, %v1147_v27 }
 0x10e   : > { %v1187_v30 = vmax.f32 %v1169_v28, 0.0 }
 0x10f   : > { %v934_v31 = vpop.f32.mrf.mxu2  ;;  %v1079_v32 = vpop.f32.mrf.mxu3 }
 0x110   : > { %v1604_v33 = vpack.c.bf16 %v1187_v30, %v1186_v29  ;;  %v646_v34 = vpop.f32.mrf.mxu0  ;;  %v791_v35 = vpop.f32.mrf.mxu1  ;;  %v1130_v37 = vmax.f32 %v934_v31, %v1079_v32 }
 0x111   : > { %v1113_v41 = vmax.f32 %v646_v34, %v791_v35 }
 0x112   : > { %1633 = vst [vmem:[%s1920_s17 + $0x18] sm:$0xff] %v1604_v33   ;;  %v1148_v38 = vmax.f32 %v1112_v36, %v1130_v37 }
 0x114   : > { %v1170_v45 = vadd.f32 %v1913_v25, %v1148_v38 }
 0x116   : > { %v1188_v48 = vmax.f32 %v1170_v45, 0.0 }
 0x117   : > { %v936_v39 = vpop.f32.mrf.mxu2  ;;  %v1081_v40 = vpop.f32.mrf.mxu3 }
 0x118   : > { %v1131_v42 = vmax.f32 %v936_v39, %v1081_v40  ;;  %v649_v43 = vpop.f32.mrf.mxu0  ;;  %v794_v44 = vpop.f32.mrf.mxu1 }
 0x119   : > { %v1114_v55 = vmax.f32 %v649_v43, %v794_v44 }
 0x11a   : > { %v1149_v46 = vmax.f32 %v1113_v41, %v1131_v42 }
 0x11c   : > { %v1171_v47 = vadd.f32 %v1913_v25, %v1149_v46 }
 0x11e   : > { %v1189_v49 = vmax.f32 %v1171_v47, 0.0 }
 0x11f   : > { %v939_v50 = vpop.f32.mrf.mxu2  ;;  %v1084_v51 = vpop.f32.mrf.mxu3 }
 0x120   : > { %v1609_v52 = vpack.c.bf16 %v1189_v49, %v1188_v48  ;;  %v651_v53 = vpop.f32.mrf.mxu0  ;;  %v796_v54 = vpop.f32.mrf.mxu1  ;;  %v1132_v56 = vmax.f32 %v939_v50, %v1084_v51 }
 0x121   : > { %v1115_v60 = vmax.f32 %v651_v53, %v796_v54 }
 0x122   : > { %1634 = vst [vmem:[%s1920_s17 + $0x20] sm:$0xff] %v1609_v52   ;;  %v1150_v57 = vmax.f32 %v1114_v55, %v1132_v56 }
 0x124   : > { %v1172_v0 = vadd.f32 %v1913_v25, %v1150_v57 }
 0x126   : > { %v1190_v3 = vmax.f32 %v1172_v0, 0.0 }
 0x127   : > { %v941_v58 = vpop.f32.mrf.mxu2  ;;  %v1086_v59 = vpop.f32.mrf.mxu3 }
 0x128   : > { %v1133_v61 = vmax.f32 %v941_v58, %v1086_v59  ;;  %v654_v62 = vpop.f32.mrf.mxu0  ;;  %v799_v63 = vpop.f32.mrf.mxu1 }
 0x129   : > { %v1116_v10 = vmax.f32 %v654_v62, %v799_v63 }
 0x12a   : > { %v1151_v1 = vmax.f32 %v1115_v60, %v1133_v61 }
 0x12c   : > { %v1173_v2 = vadd.f32 %v1913_v25, %v1151_v1 }
 0x12e   : > { %v1191_v4 = vmax.f32 %v1173_v2, 0.0 }
 0x12f   : > { %v944_v5 = vpop.f32.mrf.mxu2  ;;  %v1089_v6 = vpop.f32.mrf.mxu3 }
 0x130   : > { %v1614_v7 = vpack.c.bf16 %v1191_v4, %v1190_v3  ;;  %v656_v8 = vpop.f32.mrf.mxu0  ;;  %v801_v9 = vpop.f32.mrf.mxu1  ;;  %v1134_v11 = vmax.f32 %v944_v5, %v1089_v6 }
 0x131   : > { %v1117_v15 = vmax.f32 %v656_v8, %v801_v9 }
 0x132   : > { %1635 = vst [vmem:[%s1920_s17 + $0x28] sm:$0xff] %v1614_v7   ;;  %v1152_v12 = vmax.f32 %v1116_v10, %v1134_v11 }
 0x134   : > { %v1174_v19 = vadd.f32 %v1913_v25, %v1152_v12 }
 0x136   : > { %v1192_v22 = vmax.f32 %v1174_v19, 0.0 }
 0x137   : > { %v946_v13 = vpop.f32.mrf.mxu2  ;;  %v1091_v14 = vpop.f32.mrf.mxu3 }
 0x138   : > { %v1135_v16 = vmax.f32 %v946_v13, %v1091_v14  ;;  %v659_v17 = vpop.f32.mrf.mxu0  ;;  %v804_v18 = vpop.f32.mrf.mxu1 }
 0x139   : > { %v1118_v30 = vmax.f32 %v659_v17, %v804_v18 }
 0x13a   : > { %v1153_v20 = vmax.f32 %v1117_v15, %v1135_v16 }
 0x13c   : > { %v1175_v21 = vadd.f32 %v1913_v25, %v1153_v20 }
 0x13e   : > { %v1193_v23 = vmax.f32 %v1175_v21, 0.0 }
 0x13f   : > { %v949_v24 = vpop.f32.mrf.mxu2  ;;  %v1094_v26 = vpop.f32.mrf.mxu3 }
 0x140   : > { %v1619_v27 = vpack.c.bf16 %v1193_v23, %v1192_v22  ;;  %v661_v28 = vpop.f32.mrf.mxu0  ;;  %v806_v29 = vpop.f32.mrf.mxu1  ;;  %v1136_v31 = vmax.f32 %v949_v24, %v1094_v26 }
 0x141   : > { %v1119_v35 = vmax.f32 %v661_v28, %v806_v29 }
 0x142   : > { %1636 = vst [vmem:[%s1920_s17 + $0x30] sm:$0xff] %v1619_v27   ;;  %v1154_v32 = vmax.f32 %v1118_v30, %v1136_v31 }
 0x144   : > { %v1176_v37 = vadd.f32 %v1913_v25, %v1154_v32 }
 0x146   : > { %v1194_v42 = vmax.f32 %v1176_v37, 0.0 }
 0x147   : > { %v951_v33 = vpop.f32.mrf.mxu2  ;;  %v1096_v34 = vpop.f32.mrf.mxu3 }
 0x148   : > { %v1137_v36 = vmax.f32 %v951_v33, %v1096_v34  ;;  %v664_v39 = vpop.f32.mrf.mxu0  ;;  %v809_v40 = vpop.f32.mrf.mxu1 }
 0x149   : > { %v1120_v47 = vmax.f32 %v664_v39, %v809_v40 }
 0x14a   : > { %v1155_v38 = vmax.f32 %v1119_v35, %v1137_v36 }
 0x14c   : > { %v1177_v41 = vadd.f32 %v1913_v25, %v1155_v38 }
 0x14e   : > { %v1195_v43 = vmax.f32 %v1177_v41, 0.0 }
 0x14f   : > { %v954_v44 = vpop.f32.mrf.mxu2  ;;  %v1099_v45 = vpop.f32.mrf.mxu3 }
 0x150   : > { %v1624_v46 = vpack.c.bf16 %v1195_v43, %v1194_v42  ;;  %v1138_v48 = vmax.f32 %v954_v44, %v1099_v45  ;;  %v666_v49 = vpop.f32.mrf.mxu0  ;;  %v811_v50 = vpop.f32.mrf.mxu1 }
 0x151   : > { %v1121_v54 = vmax.f32 %v666_v49, %v811_v50 }
 0x152   : > { %1637 = vst [vmem:[%s1920_s17 + $0x38] sm:$0xff] %v1624_v46   ;;  %v1156_v51 = vmax.f32 %v1120_v47, %v1138_v48 }
 0x154   : > { %v1178_v56 = vadd.f32 %v1913_v25, %v1156_v51 }
 0x156   : > { %v1196_v59 = vmax.f32 %v1178_v56, 0.0 }
 0x157   : > { %v956_v52 = vpop.f32.mrf.mxu2  ;;  %v1101_v53 = vpop.f32.mrf.mxu3 }
 0x158   : > { %v1139_v55 = vmax.f32 %v956_v52, %v1101_v53 }
 0x15a   : > { %v1157_v57 = vmax.f32 %v1121_v54, %v1139_v55 }
 0x15c   : > { %v1179_v58 = vadd.f32 %v1913_v25, %v1157_v57 }
 0x15e   : > { %v1197_v60 = vmax.f32 %v1179_v58, 0.0 }
 0x160   : > { %v1629_v61 = vpack.c.bf16 %v1197_v60, %v1196_v59 }
 0x162   : > { %1638 = vst [vmem:[%s1920_s17 + $0x40] sm:$0xff] %v1629_v61  }
 0x163 PF: > { %p10_p9 = scmp.ge.s32.totalorder %s1729_s16, 4   ;;  %s1961_s12 = smov %s1685_s13 }
 0x164   : > { %s1962_s13 = smov %s1738_s19  ;;  %s1963_s14 = smov %s1729_s16 }
 0x165   :  { %12 = sbr.rel (!%p10_p9) target bundleno = 2 (0x2), region = 111 }

// kernel: mnist_cnn_forward.4
= control target key start
LH: loop header
LB: loop body
LE: loop exit
PB: predicated region body
PF: predicated region fallthrough
CT: control target
= control target key end

     0   :  { %s1854_s12 = smov 0   ;;  %s1856_s13 = smov 0   ;;  %s2498_s0 = inlined_call_operand.vmem [shape: bf16[4,32,800], index: 0, kind: input, shape index: {}]   ;;  %s2499_s1 = inlined_call_operand.vmem [shape: bf16[800,128], index: 1, kind: input, shape index: {}]   ;;  %s2500_s2 = inlined_call_operand.vmem [shape: f32[1,128], index: 2, kind: input, shape index: {}]   ;;  %s2501_s3 = inlined_call_operand.vmem [shape: bf16[32,128], index: 3, kind: output, shape index: {}]  }
   0x1   :  { %s1858_s14 = smov 0  }
   0x2 LB: > { %s1331_s15 = sadd.s32 4294967295, %s1832_s14   ;;  %s1871_s16 = sadd.s32 1, %s1832_s14   ;;  %s1832_s14 = sphi %s1858_s14, %s2504_s14   ;;  %s1828_s13 = sphi %s1856_s13, %s2503_s13   ;;  %s1824_s12 = sphi %s1854_s12, %s2502_s12  }
   0x3   : > { %s17_s17 = ssub.s32 %s1832_s14, %s1871_s16  ;;  %s20_s18 = sadd.s32 1, %s1828_s13 }
   0x4   : > { %p18_p0 = scmp.eq.s32.totalorder %s17_s17, 0  ;;  %p27_p1 = scmp.ne.s32.totalorder %s1828_s13, %s1824_s12 }
   0x5   : > { %p28_p2 = scmp.eq.s32.totalorder %s1832_s14, 0  ;;  %p1334_p4 = scmp.ge.s32.totalorder %s1832_s14, 2 }
   0x6   : > { %s1880_s19 = scalar_select %p18_p0, %s1828_s13, %s20_s18  }
   0x7   : > { %p29_p3 = por %p28_p2, %p27_p1  ;;  %127 = sbr.rel (%p1334_p4) target bundleno = 49 (0x31), region = 24 }
   0xc   : > { %130 = sbr.rel (!%p29_p3) target bundleno = 49 (0x31), region = 28  ;;  %s132_s20 = sand.u32 (%p29_p3), 1, %s1828_s13  }
   0xd   : > { %s1783_s21 = smul.u32 (%p29_p3), 56, %s1832_s14 }
   0xe   : > { %s1782_s22 = smul.u32 (%p29_p3), 224, %s132_s20 }
   0xf   : > { %s1888_s25 = scalar_lea.vmem (%p29_p3), %s2498_s0, %s1783_s21 }
  0x10   : > { %v153_v0 = vld [vmem:[%s1888_s25] sm:$0xff] (%p29_p3)  ;;  %v155_v1 = vld [vmem:[%s1888_s25 + $0x8] sm:$0xff] (%p29_p3)  ;;  %v157_v2 = vld [vmem:[%s1888_s25 + $0x10] sm:$0xff] (%p29_p3)  ;;  %s1893_s26 = scalar_lea.vmem (%p29_p3), [#allocation2], %s1782_s22 }
  0x11   : > { %154 = vst [vmem:[%s1893_s26] sm:$0xff] %v153_v0  ;;  %v159_v3 = vld [vmem:[%s1888_s25 + $0x1c] sm:$0xff]  ;;  %v161_v4 = vld [vmem:[%s1888_s25 + $0x24] sm:$0xff]  ;;  %v163_v5 = vld [vmem:[%s1888_s25 + $0x2c] sm:$0xff] }
  0x12   : > { %156 = vst [vmem:[%s1893_s26 + $0x8] sm:$0xff] %v155_v1  ;;  %v165_v6 = vld [vmem:[%s1888_s25 + $0x70] sm:$0xff]  ;;  %v167_v7 = vld [vmem:[%s1888_s25 + $0x78] sm:$0xff]  ;;  %v169_v8 = vld [vmem:[%s1888_s25 + $0x80] sm:$0xff] }
  0x13   : > { %158 = vst [vmem:[%s1893_s26 + $0x10] sm:$0xff] %v157_v2  ;;  %v171_v9 = vld [vmem:[%s1888_s25 + $0x8c] sm:$0xff]  ;;  %v173_v10 = vld [vmem:[%s1888_s25 + $0x94] sm:$0xff]  ;;  %v175_v11 = vld [vmem:[%s1888_s25 + $0x9c] sm:$0xff] }
  0x14   : > { %160 = vst [vmem:[%s1893_s26 + $0x1c] sm:$0xff] %v159_v3  ;;  %v177_v12 = vld [vmem:[%s1888_s25 + $0xe0] sm:$0xff]  ;;  %v179_v13 = vld [vmem:[%s1888_s25 + $0xe8] sm:$0xff]  ;;  %v181_v14 = vld [vmem:[%s1888_s25 + $0xf0] sm:$0xff] }
  0x15   : > { %162 = vst [vmem:[%s1893_s26 + $0x24] sm:$0xff] %v161_v4  ;;  %v183_v15 = vld [vmem:[%s1888_s25 + $0xfc] sm:$0xff]  ;;  %v185_v16 = vld [vmem:[%s1888_s25 + $0x104] sm:$0xff]  ;;  %v187_v17 = vld [vmem:[%s1888_s25 + $0x10c] sm:$0xff] }
  0x16   : > { %164 = vst [vmem:[%s1893_s26 + $0x2c] sm:$0xff] %v163_v5  ;;  %v189_v18 = vld [vmem:[%s1888_s25 + $0x150] sm:$0xff]  ;;  %v191_v19 = vld [vmem:[%s1888_s25 + $0x158] sm:$0xff]  ;;  %v193_v20 = vld [vmem:[%s1888_s25 + $0x160] sm:$0xff] }
  0x17   : > { %166 = vst [vmem:[%s1893_s26 + $0x38] sm:$0xff] %v165_v6  ;;  %v195_v21 = vld [vmem:[%s1888_s25 + $0x16c] sm:$0xff]  ;;  %v197_v22 = vld [vmem:[%s1888_s25 + $0x174] sm:$0xff]  ;;  %v199_v23 = vld [vmem:[%s1888_s25 + $0x17c] sm:$0xff] }
  0x18   : > { %168 = vst [vmem:[%s1893_s26 + $0x40] sm:$0xff] %v167_v7  ;;  %v1338_v24 = vld [vmem:[%s1888_s25 + $0x18] sm:$0xf]  ;;  %v1340_v25 = vld [vmem:[%s1888_s25 + $0x34] sm:$0xf] }
  0x19   : > { %170 = vst [vmem:[%s1893_s26 + $0x48] sm:$0xff] %v169_v8  ;;  %v1342_v26 = vld [vmem:[%s1888_s25 + $0x88] sm:$0xf]  ;;  %v1344_v27 = vld [vmem:[%s1888_s25 + $0xa4] sm:$0xf] }
  0x1a   : > { %172 = vst [vmem:[%s1893_s26 + $0x54] sm:$0xff] %v171_v9  ;;  %v1346_v28 = vld [vmem:[%s1888_s25 + $0xf8] sm:$0xf]  ;;  %v1348_v29 = vld [vmem:[%s1888_s25 + $0x114] sm:$0xf] }
  0x1b   : > { %174 = vst [vmem:[%s1893_s26 + $0x5c] sm:$0xff] %v173_v10  ;;  %v1350_v30 = vld [vmem:[%s1888_s25 + $0x168] sm:$0xf]  ;;  %v1352_v31 = vld [vmem:[%s1888_s25 + $0x184] sm:$0xf] }
  0x1c   : > { %176 = vst [vmem:[%s1893_s26 + $0x64] sm:$0xff] %v175_v11 }
  0x1d   : > { %178 = vst [vmem:[%s1893_s26 + $0x70] sm:$0xff] %v177_v12 }
  0x1e   : > { %180 = vst [vmem:[%s1893_s26 + $0x78] sm:$0xff] %v179_v13 }
  0x1f   : > { %182 = vst [vmem:[%s1893_s26 + $0x80] sm:$0xff] %v181_v14 }
  0x20   : > { %184 = vst [vmem:[%s1893_s26 + $0x8c] sm:$0xff] %v183_v15 }
  0x21   : > { %186 = vst [vmem:[%s1893_s26 + $0x94] sm:$0xff] %v185_v16 }
  0x22   : > { %188 = vst [vmem:[%s1893_s26 + $0x9c] sm:$0xff] %v187_v17 }
  0x23   : > { %190 = vst [vmem:[%s1893_s26 + $0xa8] sm:$0xff] %v189_v18 }
  0x24   : > { %192 = vst [vmem:[%s1893_s26 + $0xb0] sm:$0xff] %v191_v19 }
  0x25   : > { %194 = vst [vmem:[%s1893_s26 + $0xb8] sm:$0xff] %v193_v20 }
  0x26   : > { %196 = vst [vmem:[%s1893_s26 + $0xc4] sm:$0xff] %v195_v21 }
  0x27   : > { %198 = vst [vmem:[%s1893_s26 + $0xcc] sm:$0xff] %v197_v22 }
  0x28   : > { %200 = vst [vmem:[%s1893_s26 + $0xd4] sm:$0xff] %v199_v23 }
  0x29   : > { %1339 = vst [vmem:[%s1893_s26 + $0x18] sm:$0xf] %v1338_v24 }
  0x2a   : > { %1341 = vst [vmem:[%s1893_s26 + $0x34] sm:$0xf] %v1340_v25 }
  0x2b   : > { %1343 = vst [vmem:[%s1893_s26 + $0x50] sm:$0xf] %v1342_v26 }
  0x2c   : > { %1345 = vst [vmem:[%s1893_s26 + $0x6c] sm:$0xf] %v1344_v27 }
  0x2d   : > { %1347 = vst [vmem:[%s1893_s26 + $0x88] sm:$0xf] %v1346_v28 }
  0x2e   : > { %1349 = vst [vmem:[%s1893_s26 + $0xa4] sm:$0xf] %v1348_v29 }
  0x2f   : > { %1351 = vst [vmem:[%s1893_s26 + $0xc0] sm:$0xf] %v1350_v30 }
  0x30   : > { %1353 = vst [vmem:[%s1893_s26 + $0xdc] sm:$0xf] %v1352_v31 }
  0x31 PF: > { %p1354_p5 = scmp.ge.s32.totalorder %s1832_s14, 1  ;;  %p229_p6 = scmp.lt.s32.totalorder %s1832_s14, 3 }
  0x33   : > { %p230_p7 = pnand %p1354_p5, %p229_p6 }
  0x34   : > { %s236_s25 = sand.u32 (!%p230_p7), 1, %s1824_s12  }
  0x35   : > { %233 = sbr.rel (%p230_p7) target bundleno = 420 (0x1a4), region = 54 }
  0x36   : > { %s1784_s6 = smul.u32 (!%p230_p7), 224, %s236_s25 }
  0x38   : > { %s2155_s5 = scalar_lea.vmem (!%p230_p7), [#allocation2], %s1784_s6 }
  0x3a   : > { %v1961_v32 = vld [vmem:[%s2499_s1 + $0x38] sm:$0xff]  ;;  %v1983_v36 = vld [vmem:[%s2499_s1 + $0x30] sm:$0xff]  ;;  %v2007_v40 = vld [vmem:[%s2499_s1 + $0x28] sm:$0xff]  ;;  %vm710_vm0 = vcmask 261120  }
  0x3b   : > { %v1966_v33 = vld [vmem:[%s2499_s1 + $0x78] sm:$0xff]  ;;  %714 = vmatpush.bf16.msra.mxu0 %v1961_v32  ;;  %v1988_v37 = vld [vmem:[%s2499_s1 + $0x70] sm:$0xff]  ;;  %v2012_v41 = vld [vmem:[%s2499_s1 + $0x68] sm:$0xff] }
  0x3c   : > { %v1971_v34 = vld [vmem:[%s2499_s1 + $0xb8] sm:$0xff]  ;;  %728 = vmatpush.bf16.msra.mxu1 %v1966_v33  ;;  %v1995_v38 = vld [vmem:[%s2499_s1 + $0xb0] sm:$0xff]  ;;  %v2019_v42 = vld [vmem:[%s2499_s1 + $0xa8] sm:$0xff] }
  0x3d   : > { %v1976_v35 = vld [vmem:[%s2499_s1 + $0xf8] sm:$0xff]  ;;  %742 = vmatpush.bf16.msra.mxu2 %v1971_v34  ;;  %v2000_v39 = vld [vmem:[%s2499_s1 + $0xf0] sm:$0xff]  ;;  %v2024_v43 = vld [vmem:[%s2499_s1 + $0xe8] sm:$0xff] }
  0x3e   : > { %756 = vmatpush.bf16.msra.mxu3 %v1976_v35  ;;  %v2031_v44 = vld [vmem:[%s2499_s1 + $0x20] sm:$0xff]  ;;  %v2055_v48 = vld [vmem:[%s2499_s1 + $0x18] sm:$0xff]  ;;  %v2080_v52 = vld [vmem:[%s2499_s1 + $0x10] sm:$0xff] }
  0x3f   : > { %715 = vmatpush.bf16.msra.mxu0 %v1983_v36  ;;  %v2036_v45 = vld [vmem:[%s2499_s1 + $0x60] sm:$0xff]  ;;  %v2060_v49 = vld [vmem:[%s2499_s1 + $0x58] sm:$0xff]  ;;  %v2085_v53 = vld [vmem:[%s2499_s1 + $0x50] sm:$0xff] }
  0x40   : > { %729 = vmatpush.bf16.msra.mxu1 %v1988_v37  ;;  %v2043_v46 = vld [vmem:[%s2499_s1 + $0xa0] sm:$0xff]  ;;  %v2067_v50 = vld [vmem:[%s2499_s1 + $0x98] sm:$0xff]  ;;  %v2092_v54 = vld [vmem:[%s2499_s1 + $0x90] sm:$0xff] }
  0x41   : > { %743 = vmatpush.bf16.msra.mxu2 %v1995_v38  ;;  %v2048_v47 = vld [vmem:[%s2499_s1 + $0xe0] sm:$0xff]  ;;  %v2072_v51 = vld [vmem:[%s2499_s1 + $0xd8] sm:$0xff]  ;;  %v2097_v55 = vld [vmem:[%s2499_s1 + $0xd0] sm:$0xff] }
  0x42   : > { %757 = vmatpush.bf16.msra.mxu3 %v2000_v39  ;;  %v2104_v56 = vld [vmem:[%s2499_s1 + $0x8] sm:$0xff]  ;;  %v2126_v60 = vld [vmem:[%s2499_s1] sm:$0xff]  ;;  %v2148_v0 = vld [vmem:[%s2499_s1 + $0x138] sm:$0xff] }
  0x43   : > { %716 = vmatpush.bf16.msra.mxu0 %v2007_v40  ;;  %v2109_v57 = vld [vmem:[%s2499_s1 + $0x48] sm:$0xff]  ;;  %v2131_v61 = vld [vmem:[%s2499_s1 + $0x40] sm:$0xff]  ;;  %v2153_v1 = vld [vmem:[%s2499_s1 + $0x178] sm:$0xff] }
  0x44   : > { %730 = vmatpush.bf16.msra.mxu1 %v2012_v41  ;;  %v2116_v58 = vld [vmem:[%s2499_s1 + $0x88] sm:$0xff]  ;;  %v2136_v62 = vld [vmem:[%s2499_s1 + $0x80] sm:$0xff]  ;;  %v1752_v7 = vld [vmem:[%s2155_s5 + $0x18] sm:$0xf0] }
  0x45   : > { %744 = vmatpush.bf16.msra.mxu2 %v2019_v42  ;;  %v2121_v59 = vld [vmem:[%s2499_s1 + $0xc8] sm:$0xff]  ;;  %v2141_v63 = vld [vmem:[%s2499_s1 + $0xc0] sm:$0xff]  ;;  %v2181_v15 = vld [vmem:[%s2499_s1 + $0x130] sm:$0xff] }
  0x46   : > { %758 = vmatpush.bf16.msra.mxu3 %v2024_v43  ;;  %v1367_v2 = vld [vmem:[%s2155_s5 + $0x8] sm:$0xf]  ;;  %v1753_v3 = vld [vmem:[%s2155_s5 + $0x20] sm:$0xf0]  ;;  %v1750_v4 = vld [vmem:[%s2155_s5 + $0xc] sm:$0xf] }
  0x47   : > { %717 = vmatpush.bf16.msra.mxu0 %v2031_v44  ;;  %v1369_v5 = vld [vmem:[%s2155_s5 + $0x24] sm:$0xf0]  ;;  %v1359_v6 = vld [vmem:[%s2155_s5] sm:$0xf]  ;;  %v1749_v8 = vld [vmem:[%s2155_s5 + $0x4] sm:$0xf]  ;;  %v1368_v11 = vor.u32 %v1753_v3, %v1367_v2 }
  0x48   : > { %731 = vmatpush.bf16.msra.mxu1 %v2036_v45  ;;  %v1361_v9 = vld [vmem:[%s2155_s5 + $0x1c] sm:$0xf0]  ;;  %v2170_v10 = vld [vmem:[%s2499_s1 + $0x188] sm:$0xff]  ;;  %v1372_v12 = vor.u32 %v1750_v4, %v1369_v5  ;;  %v1360_v13 = vor.u32 %v1752_v7, %v1359_v6  ;;  %v2186_v16 = vld [vmem:[%s2499_s1 + $0x170] sm:$0xff] }
  0x49   : > { %745 = vmatpush.bf16.msra.mxu2 %v2043_v46  ;;  %v1364_v14 = vor.u32 %v1749_v8, %v1361_v9  ;;  %v2193_v17 = vld [vmem:[%s2499_s1 + $0x180] sm:$0xff]  ;;  %v2200_v18 = vld [vmem:[%s2499_s1 + $0x128] sm:$0xff]  ;;  %v2227_v22 = vld [vmem:[%s2499_s1 + $0x118] sm:$0xff] }
  0x4a   : > { %759 = vmatpush.bf16.msra.mxu3 %v2048_v47  ;;  %v2205_v19 = vld [vmem:[%s2499_s1 + $0x168] sm:$0xff]  ;;  %v2215_v20 = vld [vmem:[%s2499_s1 + $0x120] sm:$0xff]  ;;  %v2234_v23 = vld [vmem:[%s2499_s1 + $0x158] sm:$0xff] }
  0x4b   : > { %718 = vmatpush.bf16.msra.mxu0 %v2055_v48  ;;  %v2220_v21 = vld [vmem:[%s2499_s1 + $0x160] sm:$0xff]  ;;  %v1383_v24 = vld [vmem:[%s2155_s5 + $0x18] sm:$0xf]  ;;  %v1755_v25 = vld [vmem:[%s2155_s5 + $0x30] sm:$0xf0] }
  0x4c   : > { %732 = vmatpush.bf16.msra.mxu1 %v2060_v49  ;;  %v1384_v26 = vor.u32 %v1755_v25, %v1383_v24  ;;  %v2245_v27 = vld [vmem:[%s2499_s1 + $0x110] sm:$0xff]  ;;  %v2260_v29 = vld [vmem:[%s2499_s1 + $0x108] sm:$0xff]  ;;  %v2272_v31 = vld [vmem:[%s2499_s1 + $0x100] sm:$0xff] }
  0x4d   : > { %746 = vmatpush.bf16.msra.mxu2 %v2067_v50  ;;  %v2250_v28 = vld [vmem:[%s2499_s1 + $0x150] sm:$0xff]  ;;  %v2265_v30 = vld [vmem:[%s2499_s1 + $0x148] sm:$0xff]  ;;  %v2277_v2 = vld [vmem:[%s2499_s1 + $0x140] sm:$0xff] }
  0x4e   : > { %760 = vmatpush.bf16.msra.mxu3 %v2072_v51  ;;  %v1375_v3 = vld [vmem:[%s2155_s5 + $0x10] sm:$0xf]  ;;  %v1754_v4 = vld [vmem:[%s2155_s5 + $0x28] sm:$0xf0]  ;;  %v1751_v5 = vld [vmem:[%s2155_s5 + $0x14] sm:$0xf] }
  0x4f   : > { %719 = vmatpush.bf16.msra.mxu0 %v2080_v52  ;;  %v1377_v6 = vld [vmem:[%s2155_s5 + $0x2c] sm:$0xf0]  ;;  %v1596_v7 = vld [vmem:[%s2155_s5 + $0x38] sm:$0xf]  ;;  %v1759_v8 = vld [vmem:[%s2155_s5 + $0x50] sm:$0xf0]  ;;  %v1376_v9 = vor.u32 %v1754_v4, %v1375_v3 }
  0x50   : > { %733 = vmatpush.bf16.msra.mxu1 %v2085_v53  ;;  %v1604_v25 = vld [vmem:[%s2155_s5 + $0x40] sm:$0xf]  ;;  %v1757_v3 = vld [vmem:[%s2155_s5 + $0x44] sm:$0xf] }
  0x51   : > { %747 = vmatpush.bf16.msra.mxu2 %v2092_v54  ;;  %v1606_v4 = vld [vmem:[%s2155_s5 + $0x5c] sm:$0xf0] }
  0x52   : > { %761 = vmatpush.bf16.msra.mxu3 %v2097_v55 }
  0x53   : > { %720 = vmatpush.bf16.msra.mxu0 %v2104_v56 }
  0x54   : > { %734 = vmatpush.bf16.msra.mxu1 %v2109_v57 }
  0x55   : > { %748 = vmatpush.bf16.msra.mxu2 %v2116_v58 }
  0x56   : > { %762 = vmatpush.bf16.msra.mxu3 %v2121_v59 }
  0x57   : > { %721 = vmatpush.bf16.msra.mxu0 %v2126_v60 }
  0x58   : > { %735 = vmatpush.bf16.msra.mxu1 %v2131_v61 }
  0x59   : > { %749 = vmatpush.bf16.msra.mxu2 %v2136_v62 }
  0x5a   : > { %763 = vmatpush.bf16.msra.mxu3 %v2141_v63  ;;  %722 = vmatmul.bf16.vlgmr.msra.gmra.mxu0 %v1360_v13  ;;  %v1756_v13 = vld [vmem:[%s2155_s5 + $0x3c] sm:$0xf] }
  0x5b   : > { %770 = vmatpush.bf16.msrb.mxu0 %v2148_v0  ;;  %736 = vmatmul.bf16.vlgmr.msra.gmra.mxu1 %v1364_v14  ;;  %v1598_v14 = vld [vmem:[%s2155_s5 + $0x54] sm:$0xf0] }
  0x5c   : > { %784 = vmatpush.bf16.msrb.mxu1 %v2153_v1  ;;  %750 = vmatmul.bf16.vlgmr.msra.gmra.mxu2 %v1368_v11  ;;  %v1380_v11 = vor.u32 %v1751_v5, %v1377_v6  ;;  %v1601_v24 = vor.u32 %v1756_v13, %v1598_v14  ;;  %v1612_v5 = vld [vmem:[%s2155_s5 + $0x48] sm:$0xf]  ;;  %v1761_v6 = vld [vmem:[%s2155_s5 + $0x60] sm:$0xf0]  ;;  %v1620_v14 = vld [vmem:[%s2155_s5 + $0x50] sm:$0xf] }
  0x5d   : > { %804 = vmatpush.bf16.msrb.mxu2 %v2170_v10  ;;  %764 = vmatmul.bf16.vlgmr.msra.gmra.mxu3 %v1372_v12  ;;  %v1597_v12 = vor.u32 %v1759_v8, %v1596_v7  ;;  %v1609_v8 = vor.u32 %v1757_v3, %v1606_v4  ;;  %v1767_v3 = vld [vmem:[%s2155_s5 + $0x90] sm:$0xf0]  ;;  %v1633_v4 = vld [vmem:[%s2155_s5 + $0x70] sm:$0xf] }
  0x5e   : > { %859 = vmatpush.bf16.msrb.mxu3 %v1961_v32 }
  0x5f   : > { %771 = vmatpush.bf16.msrb.mxu0 %v2181_v15 }
  0x60   : > { %785 = vmatpush.bf16.msrb.mxu1 %v2186_v16 }
  0x61   : > { %805 = vmatpush.bf16.msrb.mxu2 %v2193_v17 }
  0x62   : > { %860 = vmatpush.bf16.msrb.mxu3 %v1983_v36 }
  0x63   : > { %772 = vmatpush.bf16.msrb.mxu0 %v2200_v18 }
  0x64   : > { %786 = vmatpush.bf16.msrb.mxu1 %v2205_v19 }
  0x65   : > { %873 = vmatpush.bf16.msra.mxu2 %v1966_v33 }
  0x66   : > { %861 = vmatpush.bf16.msrb.mxu3 %v2007_v40 }
  0x67   : > { %773 = vmatpush.bf16.msrb.mxu0 %v2215_v20 }
  0x68   : > { %787 = vmatpush.bf16.msrb.mxu1 %v2220_v21 }
  0x69   : > { %874 = vmatpush.bf16.msra.mxu2 %v1988_v37 }
  0x6a   : > { %862 = vmatpush.bf16.msrb.mxu3 %v2031_v44 }
  0x6b   : > { %774 = vmatpush.bf16.msrb.mxu0 %v2227_v22 }
  0x6c   : > { %788 = vmatpush.bf16.msrb.mxu1 %v2234_v23  ;;  %1585 = vmatmul.msk.bf16.vlgmr.msrb.gmra.mxu2 %vm710_vm0, %v1384_v26  ;;  %v1760_v26 = vld [vmem:[%s2155_s5 + $0x58] sm:$0xf0] }
  0x6d   : > { %875 = vmatpush.bf16.msra.mxu2 %v2012_v41  ;;  %v1605_v7 = vor.u32 %v1760_v26, %v1604_v25  ;;  %v1641_v26 = vld [vmem:[%s2155_s5 + $0x78] sm:$0xf] }
  0x6e   : > { %863 = vmatpush.bf16.msrb.mxu3 %v2055_v48 }
  0x6f   : > { %775 = vmatpush.bf16.msrb.mxu0 %v2245_v27 }
  0x70   : > { %789 = vmatpush.bf16.msrb.mxu1 %v2250_v28 }
  0x71   : > { %876 = vmatpush.bf16.msra.mxu2 %v2036_v45 }
  0x72   : > { %864 = vmatpush.bf16.msrb.mxu3 %v2080_v52 }
  0x73   : > { %776 = vmatpush.bf16.msrb.mxu0 %v2260_v29 }
  0x74   : > { %790 = vmatpush.bf16.msrb.mxu1 %v2265_v30 }
  0x75   : > { %877 = vmatpush.bf16.msra.mxu2 %v2060_v49 }
  0x76   : > { %865 = vmatpush.bf16.msrb.mxu3 %v2104_v56 }
  0x77   : > { %777 = vmatpush.bf16.msrb.mxu0 %v2272_v31 }
  0x78   : > { %791 = vmatpush.bf16.msrb.mxu1 %v2277_v2 }
  0x79   : > { %878 = vmatpush.bf16.msra.mxu2 %v2085_v53 }
  0x7a   : > { %866 = vmatpush.bf16.msrb.mxu3 %v2126_v60  ;;  %778 = vmatmul.bf16.vlgmr.msrb.gmra.mxu0 %v1376_v9  ;;  %v1613_v9 = vor.u32 %v1761_v6, %v1612_v5  ;;  %v1766_v5 = vld [vmem:[%s2155_s5 + $0x88] sm:$0xf0]  ;;  %v1642_v6 = vor.u32 %v1767_v3, %v1641_v26 }
  0x7b   : > { %887 = vmatpush.bf16.msra.mxu0 %v1971_v34  ;;  %792 = vmatmul.bf16.vlgmr.msrb.gmra.mxu1 %v1380_v11  ;;  %v1758_v11 = vld [vmem:[%s2155_s5 + $0x4c] sm:$0xf] }
  0x7c   : > { %901 = vmatpush.bf16.msra.mxu1 %v1976_v35 }
  0x7d   : > { %879 = vmatpush.bf16.msra.mxu2 %v2109_v57  ;;  %867 = vmatmul.bf16.vlgmr.msrb.gmra.mxu3 %v1597_v12  ;;  %v1614_v12 = vld [vmem:[%s2155_s5 + $0x64] sm:$0xf0] }
  0x7e   : > { %915 = vmatpush.bf16.msra.mxu3 %v2148_v0  ;;  %v1617_v13 = vor.u32 %v1758_v11, %v1614_v12  ;;  %v1764_v11 = vld [vmem:[%s2155_s5 + $0x7c] sm:$0xf]  ;;  %v1643_v12 = vld [vmem:[%s2155_s5 + $0x94] sm:$0xf0] }
  0x7f   : > { %888 = vmatpush.bf16.msra.mxu0 %v1995_v38 }
  0x80   : > { %902 = vmatpush.bf16.msra.mxu1 %v2000_v39 }
  0x81   : > { %880 = vmatpush.bf16.msra.mxu2 %v2131_v61 }
  0x82   : > { %916 = vmatpush.bf16.msra.mxu3 %v2181_v15 }
  0x83   : > { %889 = vmatpush.bf16.msra.mxu0 %v2019_v42 }
  0x84   : > { %881 = vmatmul.bf16.vlgmr.msra.gmra.mxu2 %v1601_v24  ;;  %903 = vmatpush.bf16.msra.mxu1 %v2024_v43  ;;  %v1762_v24 = vld [vmem:[%s2155_s5 + $0x68] sm:$0xf0] }
  0x85   : > { %929 = vmatpush.bf16.msrb.mxu2 %v2153_v1  ;;  %v1621_v25 = vor.u32 %v1762_v24, %v1620_v14  ;;  %v1646_v14 = vor.u32 %v1764_v11, %v1643_v12  ;;  %v1769_v24 = vld [vmem:[%s2155_s5 + $0xa0] sm:$0xf0] }
  0x86   : > { %917 = vmatpush.bf16.msra.mxu3 %v2200_v18 }
  0x87   : > { %890 = vmatpush.bf16.msra.mxu0 %v2043_v46 }
  0x88   : > { %904 = vmatpush.bf16.msra.mxu1 %v2048_v47 }
  0x89   : > { %930 = vmatpush.bf16.msrb.mxu2 %v2186_v16 }
  0x8a   : > { %918 = vmatpush.bf16.msra.mxu3 %v2215_v20 }
  0x8b   : > { %891 = vmatpush.bf16.msra.mxu0 %v2067_v50 }
  0x8c   : > { %905 = vmatpush.bf16.msra.mxu1 %v2072_v51 }
  0x8d   : > { %931 = vmatpush.bf16.msrb.mxu2 %v2205_v19 }
  0x8e   : > { %919 = vmatpush.bf16.msra.mxu3 %v2227_v22 }
  0x8f   : > { %892 = vmatpush.bf16.msra.mxu0 %v2092_v54 }
  0x90   : > { %906 = vmatpush.bf16.msra.mxu1 %v2097_v55 }
  0x91   : > { %932 = vmatpush.bf16.msrb.mxu2 %v2220_v21 }
  0x92   : > { %920 = vmatpush.bf16.msra.mxu3 %v2245_v27 }
  0x93   : > { %893 = vmatpush.bf16.msra.mxu0 %v2116_v58 }
  0x94   : > { %907 = vmatpush.bf16.msra.mxu1 %v2121_v59 }
  0x95   : > { %933 = vmatpush.bf16.msrb.mxu2 %v2234_v23 }
  0x96   : > { %921 = vmatpush.bf16.msra.mxu3 %v2260_v29 }
  0x97   : > { %894 = vmatpush.bf16.msra.mxu0 %v2136_v62 }
  0x98   : > { %908 = vmatpush.bf16.msra.mxu1 %v2141_v63 }
  0x99   : > { %934 = vmatpush.bf16.msrb.mxu2 %v2250_v28 }
  0x9a   : > { %922 = vmatpush.bf16.msra.mxu3 %v2272_v31  ;;  %895 = vmatmul.bf16.vlgmr.msra.gmra.mxu0 %v1605_v7  ;;  %v1634_v7 = vor.u32 %v1766_v5, %v1633_v4 }
  0x9b   : > { %1032 = vmatpush.bf16.msrb.mxu0 %v1971_v34  ;;  %909 = vmatmul.bf16.vlgmr.msra.gmra.mxu1 %v1609_v8  ;;  %v1763_v8 = vld [vmem:[%s2155_s5 + $0x74] sm:$0xf] }
  0x9c   : > { %1004 = vmatpush.bf16.msrb.mxu1 %v1961_v32 }
  0x9d   : > { %935 = vmatpush.bf16.msrb.mxu2 %v2265_v30  ;;  %923 = vmatmul.bf16.vlgmr.msra.gmra.mxu3 %v1613_v9  ;;  %v1635_v9 = vld [vmem:[%s2155_s5 + $0x8c] sm:$0xf0] }
  0x9e   : > { %949 = vmatpush.bf16.msrb.mxu3 %v2170_v10 }
  0x9f   : > { %1033 = vmatpush.bf16.msrb.mxu0 %v1995_v38 }
  0xa0   : > { %1005 = vmatpush.bf16.msrb.mxu1 %v1983_v36 }
  0xa1   : > { %936 = vmatpush.bf16.msrb.mxu2 %v2277_v2 }
  0xa2   : > { %950 = vmatpush.bf16.msrb.mxu3 %v2193_v17 }
  0xa3   : > { %1034 = vmatpush.bf16.msrb.mxu0 %v2019_v42 }
  0xa4   : > { %937 = vmatmul.bf16.vlgmr.msrb.gmra.mxu2 %v1617_v13  ;;  %1006 = vmatpush.bf16.msrb.mxu1 %v2007_v40  ;;  %v1638_v13 = vor.u32 %v1763_v8, %v1635_v9 }
  0xa5   : > { %1046 = vmatpush.bf16.msra.mxu2 %v1976_v35 }
  0xa6   : > { %1018 = vmatpush.bf16.msra.mxu3 %v1966_v33 }
  0xa7   : > { %1035 = vmatpush.bf16.msrb.mxu0 %v2043_v46 }
  0xa8   : > { %1007 = vmatpush.bf16.msrb.mxu1 %v2031_v44 }
  0xa9   : > { %1047 = vmatpush.bf16.msra.mxu2 %v2000_v39 }
  0xaa   : > { %1019 = vmatpush.bf16.msra.mxu3 %v1988_v37 }
  0xab   : > { %1036 = vmatpush.bf16.msrb.mxu0 %v2067_v50 }
  0xac   : > { %1008 = vmatpush.bf16.msrb.mxu1 %v2055_v48 }
  0xad   : > { %1048 = vmatpush.bf16.msra.mxu2 %v2024_v43  ;;  %1622 = vmatmul.msk.bf16.vlgmr.msrb.gmra.mxu3 %vm710_vm0, %v1621_v25 }
  0xae   : > { %1020 = vmatpush.bf16.msra.mxu3 %v2012_v41 }
  0xaf   : > { %1037 = vmatpush.bf16.msrb.mxu0 %v2092_v54 }
  0xb0   : > { %1009 = vmatpush.bf16.msrb.mxu1 %v2080_v52 }
  0xb1   : > { %1049 = vmatpush.bf16.msra.mxu2 %v2048_v47 }
  0xb2   : > { %1021 = vmatpush.bf16.msra.mxu3 %v2036_v45 }
  0xb3   : > { %1038 = vmatpush.bf16.msrb.mxu0 %v2116_v58 }
  0xb4   : > { %1010 = vmatpush.bf16.msrb.mxu1 %v2104_v56 }
  0xb5   : > { %1050 = vmatpush.bf16.msra.mxu2 %v2072_v51 }
  0xb6   : > { %1022 = vmatpush.bf16.msra.mxu3 %v2060_v49 }
  0xb7   : > { %1039 = vmatpush.bf16.msrb.mxu0 %v2136_v62 }
  0xb8   : > { %1011 = vmatpush.bf16.msrb.mxu1 %v2126_v60 }
  0xb9   : > { %1051 = vmatpush.bf16.msra.mxu2 %v2097_v55 }
  0xba   : > { %1023 = vmatpush.bf16.msra.mxu3 %v2085_v53  ;;  %1040 = vmatmul.bf16.vlgmr.msrb.gmra.mxu0 %v1642_v6 }
  0xbb   : > { %1094 = vmatpush.bf16.msra.mxu0 %v2170_v10  ;;  %1012 = vmatmul.bf16.vlgmr.msrb.gmra.mxu1 %v1634_v7 }
  0xbc   : > { %1060 = vmatpush.bf16.msra.mxu1 %v2148_v0 }
  0xbd   : > { %1052 = vmatpush.bf16.msra.mxu2 %v2121_v59 }
  0xbe   : > { %1024 = vmatpush.bf16.msra.mxu3 %v2109_v57 }
  0xbf   : > { %1095 = vmatpush.bf16.msra.mxu0 %v2193_v17 }
  0xc0   : > { %1061 = vmatpush.bf16.msra.mxu1 %v2181_v15 }
  0xc1   : > { %1053 = vmatpush.bf16.msra.mxu2 %v2141_v63 }
  0xc2   : > { %1025 = vmatpush.bf16.msra.mxu3 %v2131_v61 }
  0xc3   : > { %1163 = vmatpush.bf16.msrb.mxu0 %v1966_v33  ;;  %v1657_v33 = vld [vmem:[%s2155_s5 + $0x88] sm:$0xf] }
  0xc4   : > { %1054 = vmatmul.bf16.vlgmr.msra.gmra.mxu2 %v1646_v14  ;;  %1062 = vmatpush.bf16.msra.mxu1 %v2200_v18 }
  0xc5   : > { %1149 = vmatpush.bf16.msrb.mxu2 %v1961_v32  ;;  %1026 = vmatmul.bf16.vlgmr.msra.gmra.mxu3 %v1638_v13  ;;  %v1658_v32 = vor.u32 %v1769_v24, %v1657_v33 }
  0xc6   : > { %1074 = vmatpush.bf16.msrb.mxu3 %v2153_v1 }
  0xc7   : > { %1164 = vmatpush.bf16.msrb.mxu0 %v1988_v37  ;;  %v1768_v37 = vld [vmem:[%s2155_s5 + $0x98] sm:$0xf0] }
  0xc8   : > { %1063 = vmatpush.bf16.msra.mxu1 %v2215_v20 }
  0xc9   : > { %1150 = vmatpush.bf16.msrb.mxu2 %v1983_v36  ;;  %v1649_v36 = vld [vmem:[%s2155_s5 + $0x80] sm:$0xf] }
  0xca   : > { %1075 = vmatpush.bf16.msrb.mxu3 %v2186_v16  ;;  %1659 = vmatmul.msk.bf16.vlgmr.msra.gmra.mxu0 %vm710_vm0, %v1658_v32 }
  0xcb   : > { %1165 = vmatpush.bf16.msrb.mxu0 %v2012_v41  ;;  %v1765_v41 = vld [vmem:[%s2155_s5 + $0x84] sm:$0xf] }
  0xcc   : > { %1064 = vmatpush.bf16.msra.mxu1 %v2227_v22 }
  0xcd   : > { %1151 = vmatpush.bf16.msrb.mxu2 %v2007_v40  ;;  %v1650_v40 = vor.u32 %v1768_v37, %v1649_v36 }
  0xce   : > { %1076 = vmatpush.bf16.msrb.mxu3 %v2205_v19 }
  0xcf   : > { %1166 = vmatpush.bf16.msrb.mxu0 %v2036_v45  ;;  %v1770_v45 = vld [vmem:[%s2155_s5 + $0xac] sm:$0xf] }
  0xd0   : > { %1065 = vmatpush.bf16.msra.mxu1 %v2245_v27 }
  0xd1   : > { %1152 = vmatpush.bf16.msrb.mxu2 %v2031_v44  ;;  %v1651_v44 = vld [vmem:[%s2155_s5 + $0x9c] sm:$0xf0] }
  0xd2   : > { %1077 = vmatpush.bf16.msrb.mxu3 %v2220_v21 }
  0xd3   : > { %1167 = vmatpush.bf16.msrb.mxu0 %v2060_v49  ;;  %v1670_v49 = vld [vmem:[%s2155_s5 + $0xa8] sm:$0xf] }
  0xd4   : > { %1066 = vmatpush.bf16.msra.mxu1 %v2260_v29 }
  0xd5   : > { %1153 = vmatpush.bf16.msrb.mxu2 %v2055_v48  ;;  %v1672_v48 = vld [vmem:[%s2155_s5 + $0xc4] sm:$0xf0] }
  0xd6   : > { %1078 = vmatpush.bf16.msrb.mxu3 %v2234_v23  ;;  %v1675_v25 = vor.u32 %v1770_v45, %v1672_v48 }
  0xd7   : > { %1168 = vmatpush.bf16.msrb.mxu0 %v2085_v53  ;;  %v1773_v53 = vld [vmem:[%s2155_s5 + $0xc0] sm:$0xf0] }
  0xd8   : > { %1067 = vmatpush.bf16.msra.mxu1 %v2272_v31 }
  0xd9   : > { %1154 = vmatpush.bf16.msrb.mxu2 %v2080_v52  ;;  %v1654_v52 = vor.u32 %v1765_v41, %v1651_v44 }
  0xda   : > { %1079 = vmatpush.bf16.msrb.mxu3 %v2250_v28 }
  0xdb   : > { %1169 = vmatpush.bf16.msrb.mxu0 %v2109_v57  ;;  %1068 = vmatmul.bf16.vlgmr.msra.gmra.mxu1 %v1650_v40  ;;  %v1671_v57 = vor.u32 %v1773_v53, %v1670_v49 }
  0xdc   : > { %1177 = vmatpush.bf16.msrb.mxu1 %v1971_v34  ;;  %v723_v34 = vpop.f32.mrf.mxu0 }
  0xdd   : > { %1155 = vmatpush.bf16.msrb.mxu2 %v2104_v56  ;;  %v737_v56 = vpop.f32.mrf.mxu1 }
  0xde   : > { %1080 = vmatpush.bf16.msrb.mxu3 %v2265_v30 }
  0xdf   : > { %1170 = vmatpush.bf16.msrb.mxu0 %v2131_v61 }
  0xe0   : > { %1178 = vmatpush.bf16.msrb.mxu1 %v1995_v38  ;;  %v765_v38 = vpop.f32.mrf.mxu3 }
  0xe1   : > { %1156 = vmatpush.bf16.msrb.mxu2 %v2126_v60  ;;  %v738_v60 = vadd.f32 %v737_v56, %v723_v34 }
  0xe2   : > { %1081 = vmatpush.bf16.msrb.mxu3 %v2277_v2  ;;  %1171 = vmatmul.bf16.vlgmr.msrb.gmra.mxu0 %v1675_v25 }
  0xe3   : > { %1219 = vmatpush.bf16.msra.mxu0 %v2153_v1  ;;  %v1678_v1 = vld [vmem:[%s2155_s5 + $0xb0] sm:$0xf] }
  0xe4   : > { %1157 = vmatmul.bf16.vlgmr.msrb.gmra.mxu2 %v1671_v57  ;;  %1179 = vmatpush.bf16.msrb.mxu1 %v2019_v42  ;;  %v725_v42 = vpop.f32.mrf.mxu0 }
  0xe5   : > { %1205 = vmatpush.bf16.msra.mxu2 %v2148_v0  ;;  %1082 = vmatmul.bf16.vlgmr.msrb.gmra.mxu3 %v1654_v52 }
  0xe6   : > { %1191 = vmatpush.bf16.msra.mxu3 %v1976_v35  ;;  %v751_v35 = vpop.f32.mrf.mxu2 }
  0xe7   : > { %1220 = vmatpush.bf16.msra.mxu0 %v2186_v16  ;;  %v752_v61 = vadd.f32 %v751_v35, %v738_v60  ;;  %v1772_v16 = vld [vmem:[%s2155_s5 + $0xbc] sm:$0xf] }
  0xe8   : > { %1180 = vmatpush.bf16.msrb.mxu1 %v2043_v46  ;;  %v739_v46 = vpop.f32.mrf.mxu1 }
  0xe9   : > { %1206 = vmatpush.bf16.msra.mxu2 %v2181_v15  ;;  %v740_v0 = vadd.f32 %v739_v46, %v725_v42  ;;  %v1774_v15 = vld [vmem:[%s2155_s5 + $0xc8] sm:$0xf0] }
  0xea   : > { %1192 = vmatpush.bf16.msra.mxu3 %v2000_v39  ;;  %v766_v39 = vadd.f32 %v765_v38, %v752_v61 }
  0xeb   : > { %1221 = vmatpush.bf16.msra.mxu0 %v2205_v19  ;;  %v1771_v19 = vld [vmem:[%s2155_s5 + $0xb4] sm:$0xf] }
  0xec   : > { %1181 = vmatpush.bf16.msrb.mxu1 %v2067_v50 }
  0xed   : > { %1207 = vmatpush.bf16.msra.mxu2 %v2200_v18  ;;  %v1688_v18 = vld [vmem:[%s2155_s5 + $0xd4] sm:$0xf0] }
  0xee   : > { %1193 = vmatpush.bf16.msra.mxu3 %v2024_v43  ;;  %v753_v43 = vpop.f32.mrf.mxu2 }
  0xef   : > { %1222 = vmatpush.bf16.msra.mxu0 %v2220_v21  ;;  %v754_v50 = vadd.f32 %v753_v43, %v740_v0  ;;  %v1775_v21 = vld [vmem:[%s2155_s5 + $0xd0] sm:$0xf0] }
  0xf0   : > { %1182 = vmatpush.bf16.msrb.mxu1 %v2092_v54  ;;  %v1679_v54 = vor.u32 %v1774_v15, %v1678_v1 }
  0xf1   : > { %1208 = vmatpush.bf16.msra.mxu2 %v2215_v20  ;;  %v1686_v20 = vld [vmem:[%s2155_s5 + $0xb8] sm:$0xf] }
  0xf2   : > { %1194 = vmatpush.bf16.msra.mxu3 %v2048_v47  ;;  %v767_v47 = vpop.f32.mrf.mxu3 }
  0xf3   : > { %1223 = vmatpush.bf16.msra.mxu0 %v2234_v23 }
  0xf4   : > { %1183 = vmatpush.bf16.msrb.mxu1 %v2116_v58  ;;  %v1680_v58 = vld [vmem:[%s2155_s5 + $0xcc] sm:$0xf0] }
  0xf5   : > { %1209 = vmatpush.bf16.msra.mxu2 %v2227_v22  ;;  %v1683_v23 = vor.u32 %v1771_v19, %v1680_v58 }
  0xf6   : > { %1195 = vmatpush.bf16.msra.mxu3 %v2072_v51  ;;  %v768_v51 = vadd.f32 %v767_v47, %v754_v50  ;;  %v807_v22 = vpop.f32.mrf.mxu2 }
  0xf7   : > { %1224 = vmatpush.bf16.msra.mxu0 %v2250_v28 }
  0xf8   : > { %1184 = vmatpush.bf16.msrb.mxu1 %v2136_v62 }
  0xf9   : > { %1210 = vmatpush.bf16.msra.mxu2 %v2245_v27  ;;  %v1687_v27 = vor.u32 %v1775_v21, %v1686_v20 }
  0xfa   : > { %1196 = vmatpush.bf16.msra.mxu3 %v2097_v55  ;;  %v1691_v55 = vor.u32 %v1772_v16, %v1688_v18 }
  0xfb   : > { %1225 = vmatpush.bf16.msra.mxu0 %v2265_v30  ;;  %1185 = vmatmul.bf16.vlgmr.msrb.gmra.mxu1 %v1679_v54  ;;  %v1694_v30 = vld [vmem:[%s2155_s5 + $0xc0] sm:$0xf] }
  0xfc   : > { %1239 = vmatpush.bf16.msra.mxu1 %v2170_v10  ;;  %v793_v10 = vpop.f32.mrf.mxu1 }
  0xfd   : > { %1211 = vmatpush.bf16.msra.mxu2 %v2260_v29 }
  0xfe   : > { %1197 = vmatpush.bf16.msra.mxu3 %v2121_v59  ;;  %v779_v59 = vpop.f32.mrf.mxu0  ;;  %v809_v28 = vpop.f32.mrf.mxu2 }
  0xff   : > { %1226 = vmatpush.bf16.msra.mxu0 %v2277_v2  ;;  %v780_v62 = vadd.f32 %v779_v59, %v766_v39  ;;  %v1776_v2 = vld [vmem:[%s2155_s5 + $0xd8] sm:$0xf0]  ;;  %s1355_s5 = sshll.u32 %s1331_s15, 1 }
 0x100   : > { %1240 = vmatpush.bf16.msra.mxu1 %v2193_v17  ;;  %v1695_v3 = vor.u32 %v1776_v2, %v1694_v30  ;;  %v868_v6 = vpop.f32.mrf.mxu3  ;;  %p261_p8 = scmp.lt.s32.totalorder %s1355_s5, 3 }
 0x101   : > { %1212 = vmatpush.bf16.msra.mxu2 %v2272_v31  ;;  %v794_v29 = vadd.f32 %v793_v10, %v780_v62 }
 0x102   : > { %1198 = vmatpush.bf16.msra.mxu3 %v2141_v63  ;;  %1227 = vmatmul.bf16.vlgmr.msra.gmra.mxu0 %v1691_v55  ;;  %s2506_s5 = smov (!%p261_p8, %s1355_s5), 3 }
 0x103   : > { %v2470_v26 = vadd.f32 %v807_v22, %v794_v29  ;;  %s1356_s14 = sshll.u32 %s2506_s5, 2 }
 0x104   : > { %1213 = vmatmul.bf16.vlgmr.msra.gmra.mxu2 %v1687_v27  ;;  %v795_v63 = vpop.f32.mrf.mxu1  ;;  %s264_s26 = scalar_lea.vmem %s2501_s3, %s1356_s14 }
 0x105   : > { %1199 = vmatmul.bf16.vlgmr.msra.gmra.mxu3 %v1683_v23 }
 0x106   : > { %v781_v4 = vpop.f32.mrf.mxu0 }
 0x107   : > { %v782_v5 = vadd.f32 %v781_v4, %v768_v51  ;;  %v882_v17 = vpop.f32.mrf.mxu2 }
 0x108   : > { %v883_v8 = vadd.f32 %v882_v17, %v868_v6  ;;  %v870_v9 = vpop.f32.mrf.mxu3 }
 0x109   : > { %v796_v31 = vadd.f32 %v795_v63, %v782_v5 }
 0x10b   : > { %1696 = vmatmul.msk.bf16.vlgmr.msra.gmra.mxu1 %vm710_vm0, %v1695_v3  ;;  %v2473_v7 = vadd.f32 %v809_v28, %v796_v31 }
 0x10f   : > { %v884_v33 = vpop.f32.mrf.mxu2 }
 0x110   : > { %v885_v32 = vadd.f32 %v884_v33, %v870_v9 }
 0x117   : > { %v896_v11 = vpop.f32.mrf.mxu0 }
 0x118   : > { %v910_v12 = vpop.f32.mrf.mxu1  ;;  %v897_v13 = vadd.f32 %v896_v11, %v883_v8 }
 0x11a   : > { %v911_v14 = vadd.f32 %v910_v12, %v897_v13 }
 0x11f   : > { %v898_v37 = vpop.f32.mrf.mxu0 }
 0x120   : > { %v924_v24 = vpop.f32.mrf.mxu3  ;;  %v899_v40 = vadd.f32 %v898_v37, %v885_v32  ;;  %v912_v41 = vpop.f32.mrf.mxu1 }
 0x121   : > { %v925_v36 = vadd.f32 %v924_v24, %v911_v14 }
 0x122   : > { %v913_v44 = vadd.f32 %v912_v41, %v899_v40 }
 0x127   : > { %v938_v49 = vpop.f32.mrf.mxu2 }
 0x128   : > { %v926_v45 = vpop.f32.mrf.mxu3  ;;  %v939_v53 = vadd.f32 %v938_v49, %v925_v36 }
 0x129   : > { %v927_v48 = vadd.f32 %v926_v45, %v913_v44 }
 0x12f   : > { %v940_v34 = vpop.f32.mrf.mxu2 }
 0x130   : > { %v952_v52 = vpop.f32.mrf.mxu3  ;;  %v941_v56 = vadd.f32 %v940_v34, %v927_v48  ;;  %v1809_v48 = vld [vmem:[%s2500_s2] ss:$0 sm:$0xff] }
 0x131   : > { %v953_v25 = vadd.f32 %v952_v52, %v939_v53 }
 0x133   : > { %v1247_v57 = vmax.f32 %v2470_v26, %v953_v25 }
 0x137   : > { %v1041_v61 = vpop.f32.mrf.mxu0 }
 0x138   : > { %v954_v60 = vpop.f32.mrf.mxu3  ;;  %v1013_v39 = vpop.f32.mrf.mxu1 }
 0x139   : > { %v2476_v35 = vadd.f32 %v954_v60, %v941_v56 }
 0x13b   : > { %v1248_v38 = vmax.f32 %v2473_v7, %v2476_v35 }
 0x13f   : > { %v1043_v42 = vpop.f32.mrf.mxu0 }
 0x140   : > { %v1015_v0 = vpop.f32.mrf.mxu1 }
 0x147   : > { %v1055_v43 = vpop.f32.mrf.mxu2  ;;  %v1097_v47 = vpop.f32.mrf.mxu0 }
 0x148   : > { %v1027_v46 = vpop.f32.mrf.mxu3 }
 0x149   : > { %v1028_v55 = vadd.f32 %v1027_v46, %v1013_v39 }
 0x14b   : > { %v1042_v27 = vadd.f32 %v1041_v61, %v1028_v55 }
 0x14d   : > { %v1056_v30 = vadd.f32 %v1055_v43, %v1042_v27 }
 0x14f   : > { %v1057_v15 = vpop.f32.mrf.mxu2  ;;  %v1099_v51 = vpop.f32.mrf.mxu0 }
 0x150   : > { %v1029_v1 = vpop.f32.mrf.mxu3 }
 0x151   : > { %v1030_v62 = vadd.f32 %v1029_v1, %v1015_v0 }
 0x153   : > { %v1044_v3 = vadd.f32 %v1043_v42, %v1030_v62 }
 0x155   : > { %v1058_v7 = vadd.f32 %v1057_v15, %v1044_v3 }
 0x158   : > { %v1069_v50 = vpop.f32.mrf.mxu1 }
 0x159   : > { %v1070_v4 = vadd.f32 %v1069_v50, %v1056_v30 }
 0x15f   : > { %v1172_v19 = vpop.f32.mrf.mxu0 }
 0x160   : > { %v1071_v54 = vpop.f32.mrf.mxu1 }
 0x161   : > { %v1072_v12 = vadd.f32 %v1071_v54, %v1058_v7 }
 0x167   : > { %v1158_v18 = vpop.f32.mrf.mxu2  ;;  %v1174_v22 = vpop.f32.mrf.mxu0 }
 0x168   : > { %v1083_v16 = vpop.f32.mrf.mxu3  ;;  %v1173_v23 = vadd.f32 %v1172_v19, %v1158_v18 }
 0x169   : > { %v1084_v63 = vadd.f32 %v1083_v16, %v1070_v4 }
 0x16b   : > { %v1098_v13 = vadd.f32 %v1097_v47, %v1084_v63 }
 0x16f   : > { %v1160_v21 = vpop.f32.mrf.mxu2 }
 0x170   : > { %v1085_v20 = vpop.f32.mrf.mxu3  ;;  %v1175_v31 = vadd.f32 %v1174_v22, %v1160_v21 }
 0x171   : > { %v1086_v24 = vadd.f32 %v1085_v20, %v1072_v12 }
 0x173   : > { %v1100_v44 = vadd.f32 %v1099_v51, %v1086_v24 }
 0x178   : > { %v1186_v58 = vpop.f32.mrf.mxu1 }
 0x179   : > { %v1187_v10 = vadd.f32 %v1186_v58, %v1173_v23 }
 0x17f   : > { %v1228_v26 = vpop.f32.mrf.mxu0 }
 0x180   : > { %v1188_v59 = vpop.f32.mrf.mxu1 }
 0x181   : > { %v1189_v8 = vadd.f32 %v1188_v59, %v1175_v31 }
 0x187   : > { %v1214_v29 = vpop.f32.mrf.mxu2  ;;  %v1230_v37 = vpop.f32.mrf.mxu0 }
 0x188   : > { %v1200_v28 = vpop.f32.mrf.mxu3  ;;  %v1242_v17 = vpop.f32.mrf.mxu1 }
 0x189   : > { %v1201_v2 = vadd.f32 %v1200_v28, %v1187_v10 }
 0x18b   : > { %v1215_v5 = vadd.f32 %v1214_v29, %v1201_v2 }
 0x18d   : > { %v1229_v6 = vadd.f32 %v1228_v26, %v1215_v5 }
 0x18f   : > { %v1243_v9 = vadd.f32 %v1242_v17, %v1229_v6  ;;  %v1216_v33 = vpop.f32.mrf.mxu2 }
 0x190   : > { %v1202_v11 = vpop.f32.mrf.mxu3  ;;  %v1244_v41 = vpop.f32.mrf.mxu1 }
 0x191   : > { %v1203_v14 = vadd.f32 %v1202_v11, %v1189_v8  ;;  %v1249_v32 = vmax.f32 %v1098_v13, %v1243_v9 }
 0x193   : > { %v1217_v36 = vadd.f32 %v1216_v33, %v1203_v14  ;;  %v1251_v45 = vmax.f32 %v1247_v57, %v1249_v32 }
 0x195   : > { %v1231_v40 = vadd.f32 %v1230_v37, %v1217_v36  ;;  %v1257_v52 = vadd.f32 %v1809_v48, %v1251_v45 }
 0x197   : > { %v1245_v49 = vadd.f32 %v1244_v41, %v1231_v40  ;;  %v1259_v56 = vmax.f32 %v1257_v52, 0.0 }
 0x199   : > { %v1250_v53 = vmax.f32 %v1100_v44, %v1245_v49 }
 0x19b   : > { %v1252_v25 = vmax.f32 %v1248_v38, %v1250_v53 }
 0x19d   : > { %v1258_v34 = vadd.f32 %v1809_v48, %v1252_v25 }
 0x19f   : > { %v1260_v60 = vmax.f32 %v1258_v34, 0.0 }
 0x1a1   : > { %v1780_v35 = vpack.c.bf16 %v1260_v60, %v1259_v56 }
 0x1a3   : > { %1781 = vst [vmem:[%s264_s26] sm:$0xff] %v1780_v35  }
 0x1a4 PF: > { %p10_p9 = scmp.ge.s32.totalorder %s1871_s16, 4   ;;  %s2502_s12 = smov %s1828_s13 }
 0x1a5   : > { %s2503_s13 = smov %s1880_s19  ;;  %s2504_s14 = smov %s1871_s16 }
 0x1a6   :  { %12 = sbr.rel (!%p10_p9) target bundleno = 2 (0x2), region = 102 }

// kernel: mnist_cnn_forward.5
= control target key start
LH: loop header
LB: loop body
LE: loop exit
PB: predicated region body
PF: predicated region fallthrough
CT: control target
= control target key end

     0   :  { %s2767_s1 = inlined_call_operand.vmem [shape: bf16[2048,128], index: 1, kind: input, shape index: {}]   ;;  %s2768_s2 = inlined_call_operand.vmem [shape: f32[1,128], index: 2, kind: input, shape index: {}]   ;;  %s2769_s0 = inlined_call_operand.vmem [shape: bf16[16,2048], index: 0, kind: input, shape index: {}]   ;;  %s2770_s4 = inlined_call_operand.vmem [shape: f32[1,128], index: 4, kind: input, shape index: {}]   ;;  %s2771_s3 = inlined_call_operand.vmem [shape: bf16[128,128], index: 3, kind: input, shape index: {}]   ;;  %s2772_s5 = inlined_call_operand.vmem [shape: f32[16,128], index: 5, kind: output, shape index: {}]  }
   0x1   :  { %v2090_v0 = vld [vmem:[%s2767_s1 + $0x38] sm:$0xff]  ;;  %v2089_v4 = vld [vmem:[%s2767_s1 + $0x30] sm:$0xff]  ;;  %v2088_v8 = vld [vmem:[%s2767_s1 + $0x28] sm:$0xff] }
   0x2   :  { %v2098_v1 = vld [vmem:[%s2767_s1 + $0x78] sm:$0xff]  ;;  %1144 = vmatpush.bf16.msra.mxu0 %v2090_v0  ;;  %v2097_v5 = vld [vmem:[%s2767_s1 + $0x70] sm:$0xff]  ;;  %v2096_v9 = vld [vmem:[%s2767_s1 + $0x68] sm:$0xff] }
   0x3   :  { %v2106_v2 = vld [vmem:[%s2767_s1 + $0xb8] sm:$0xff]  ;;  %1158 = vmatpush.bf16.msra.mxu1 %v2098_v1  ;;  %v2105_v6 = vld [vmem:[%s2767_s1 + $0xb0] sm:$0xff]  ;;  %v2104_v10 = vld [vmem:[%s2767_s1 + $0xa8] sm:$0xff] }
   0x4   :  { %v2114_v3 = vld [vmem:[%s2767_s1 + $0xf8] sm:$0xff]  ;;  %1172 = vmatpush.bf16.msra.mxu2 %v2106_v2  ;;  %v2113_v7 = vld [vmem:[%s2767_s1 + $0xf0] sm:$0xff]  ;;  %v2112_v11 = vld [vmem:[%s2767_s1 + $0xe8] sm:$0xff] }
   0x5   :  { %1186 = vmatpush.bf16.msra.mxu3 %v2114_v3  ;;  %v2087_v12 = vld [vmem:[%s2767_s1 + $0x20] sm:$0xff]  ;;  %v2086_v16 = vld [vmem:[%s2767_s1 + $0x18] sm:$0xff]  ;;  %v2085_v20 = vld [vmem:[%s2767_s1 + $0x10] sm:$0xff] }
   0x6   :  { %1145 = vmatpush.bf16.msra.mxu0 %v2089_v4  ;;  %v2095_v13 = vld [vmem:[%s2767_s1 + $0x60] sm:$0xff]  ;;  %v2094_v17 = vld [vmem:[%s2767_s1 + $0x58] sm:$0xff]  ;;  %v2093_v21 = vld [vmem:[%s2767_s1 + $0x50] sm:$0xff] }
   0x7   :  { %1159 = vmatpush.bf16.msra.mxu1 %v2097_v5  ;;  %v2103_v14 = vld [vmem:[%s2767_s1 + $0xa0] sm:$0xff]  ;;  %v2102_v18 = vld [vmem:[%s2767_s1 + $0x98] sm:$0xff]  ;;  %v2101_v22 = vld [vmem:[%s2767_s1 + $0x90] sm:$0xff] }
   0x8   :  { %1173 = vmatpush.bf16.msra.mxu2 %v2105_v6  ;;  %v2111_v15 = vld [vmem:[%s2767_s1 + $0xe0] sm:$0xff]  ;;  %v2110_v19 = vld [vmem:[%s2767_s1 + $0xd8] sm:$0xff]  ;;  %v2109_v23 = vld [vmem:[%s2767_s1 + $0xd0] sm:$0xff] }
   0x9   :  { %1187 = vmatpush.bf16.msra.mxu3 %v2113_v7  ;;  %v2084_v24 = vld [vmem:[%s2767_s1 + $0x8] sm:$0xff]  ;;  %v2083_v28 = vld [vmem:[%s2767_s1] sm:$0xff]  ;;  %v2122_v32 = vld [vmem:[%s2767_s1 + $0x138] sm:$0xff] }
   0xa   :  { %1146 = vmatpush.bf16.msra.mxu0 %v2088_v8  ;;  %v2092_v25 = vld [vmem:[%s2767_s1 + $0x48] sm:$0xff]  ;;  %v2091_v29 = vld [vmem:[%s2767_s1 + $0x40] sm:$0xff]  ;;  %v2130_v33 = vld [vmem:[%s2767_s1 + $0x178] sm:$0xff] }
   0xb   :  { %1160 = vmatpush.bf16.msra.mxu1 %v2096_v9  ;;  %v2100_v26 = vld [vmem:[%s2767_s1 + $0x88] sm:$0xff]  ;;  %v2099_v30 = vld [vmem:[%s2767_s1 + $0x80] sm:$0xff]  ;;  %v2138_v42 = vld [vmem:[%s2767_s1 + $0x1b8] sm:$0xff] }
   0xc   :  { %1174 = vmatpush.bf16.msra.mxu2 %v2104_v10  ;;  %v2108_v27 = vld [vmem:[%s2767_s1 + $0xc8] sm:$0xff]  ;;  %v2107_v31 = vld [vmem:[%s2767_s1 + $0xc0] sm:$0xff]  ;;  %v2146_v43 = vld [vmem:[%s2767_s1 + $0x1f8] sm:$0xff] }
   0xd   :  { %1188 = vmatpush.bf16.msra.mxu3 %v2112_v11  ;;  %v1461_v34 = vld [vmem:[%s2769_s0] sm:$0xf]  ;;  %v1469_v36 = vld [vmem:[%s2769_s0 + $0x8] sm:$0xf]  ;;  %v2067_v38 = vld [vmem:[%s2769_s0 + $0x4] sm:$0xf] }
   0xe   :  { %1147 = vmatpush.bf16.msra.mxu0 %v2087_v12  ;;  %v2075_v35 = vld [vmem:[%s2769_s0 + $0x3c] sm:$0xf0]  ;;  %v2076_v37 = vld [vmem:[%s2769_s0 + $0x44] sm:$0xf0]  ;;  %v1463_v39 = vld [vmem:[%s2769_s0 + $0x40] sm:$0xf0] }
   0xf   :  { %1161 = vmatpush.bf16.msra.mxu1 %v2095_v13  ;;  %v2068_v40 = vld [vmem:[%s2769_s0 + $0xc] sm:$0xf]  ;;  %v1462_v44 = vor.u32 %v2075_v35, %v1461_v34  ;;  %v1470_v45 = vor.u32 %v2076_v37, %v1469_v36  ;;  %v1466_v46 = vor.u32 %v2067_v38, %v1463_v39  ;;  %v2121_v48 = vld [vmem:[%s2767_s1 + $0x130] sm:$0xff]  ;;  %v2119_v56 = vld [vmem:[%s2767_s1 + $0x120] sm:$0xff] }
  0x10   :  { %1175 = vmatpush.bf16.msra.mxu2 %v2103_v14  ;;  %v1471_v41 = vld [vmem:[%s2769_s0 + $0x48] sm:$0xf0]  ;;  %v2129_v49 = vld [vmem:[%s2767_s1 + $0x170] sm:$0xff]  ;;  %v2127_v57 = vld [vmem:[%s2767_s1 + $0x160] sm:$0xff] }
  0x11   :  { %1189 = vmatpush.bf16.msra.mxu3 %v2111_v15  ;;  %v1474_v47 = vor.u32 %v2068_v40, %v1471_v41  ;;  %v2137_v50 = vld [vmem:[%s2767_s1 + $0x1b0] sm:$0xff]  ;;  %v2120_v52 = vld [vmem:[%s2767_s1 + $0x128] sm:$0xff]  ;;  %v2135_v58 = vld [vmem:[%s2767_s1 + $0x1a0] sm:$0xff] }
  0x12   :  { %1148 = vmatpush.bf16.msra.mxu0 %v2086_v16  ;;  %v2145_v51 = vld [vmem:[%s2767_s1 + $0x1f0] sm:$0xff]  ;;  %v2128_v53 = vld [vmem:[%s2767_s1 + $0x168] sm:$0xff]  ;;  %v2143_v59 = vld [vmem:[%s2767_s1 + $0x1e0] sm:$0xff] }
  0x13   :  { %1162 = vmatpush.bf16.msra.mxu1 %v2094_v17  ;;  %v2136_v54 = vld [vmem:[%s2767_s1 + $0x1a8] sm:$0xff]  ;;  %v2118_v60 = vld [vmem:[%s2767_s1 + $0x118] sm:$0xff]  ;;  %v2117_v0 = vld [vmem:[%s2767_s1 + $0x110] sm:$0xff] }
  0x14   :  { %1176 = vmatpush.bf16.msra.mxu2 %v2102_v18  ;;  %v2144_v55 = vld [vmem:[%s2767_s1 + $0x1e8] sm:$0xff]  ;;  %v2126_v61 = vld [vmem:[%s2767_s1 + $0x158] sm:$0xff]  ;;  %v2125_v1 = vld [vmem:[%s2767_s1 + $0x150] sm:$0xff] }
  0x15   :  { %1190 = vmatpush.bf16.msra.mxu3 %v2110_v19  ;;  %v2134_v62 = vld [vmem:[%s2767_s1 + $0x198] sm:$0xff]  ;;  %v2133_v2 = vld [vmem:[%s2767_s1 + $0x190] sm:$0xff]  ;;  %v2116_v4 = vld [vmem:[%s2767_s1 + $0x108] sm:$0xff] }
  0x16   :  { %1149 = vmatpush.bf16.msra.mxu0 %v2085_v20  ;;  %v2142_v63 = vld [vmem:[%s2767_s1 + $0x1d8] sm:$0xff]  ;;  %v2141_v3 = vld [vmem:[%s2767_s1 + $0x1d0] sm:$0xff]  ;;  %v2124_v5 = vld [vmem:[%s2767_s1 + $0x148] sm:$0xff] }
  0x17   :  { %1163 = vmatpush.bf16.msra.mxu1 %v2093_v21  ;;  %v2132_v6 = vld [vmem:[%s2767_s1 + $0x188] sm:$0xff]  ;;  %v2115_v8 = vld [vmem:[%s2767_s1 + $0x100] sm:$0xff]  ;;  %v2154_v12 = vld [vmem:[%s2767_s1 + $0x238] sm:$0xff] }
  0x18   :  { %1177 = vmatpush.bf16.msra.mxu2 %v2101_v22  ;;  %v2140_v7 = vld [vmem:[%s2767_s1 + $0x1c8] sm:$0xff]  ;;  %v2123_v9 = vld [vmem:[%s2767_s1 + $0x140] sm:$0xff]  ;;  %v2162_v13 = vld [vmem:[%s2767_s1 + $0x278] sm:$0xff] }
  0x19   :  { %1191 = vmatpush.bf16.msra.mxu3 %v2109_v23  ;;  %v2131_v10 = vld [vmem:[%s2767_s1 + $0x180] sm:$0xff]  ;;  %v1477_v14 = vld [vmem:[%s2769_s0 + $0x10] sm:$0xf]  ;;  %v1485_v16 = vld [vmem:[%s2769_s0 + $0x18] sm:$0xf] }
  0x1a   :  { %1150 = vmatpush.bf16.msra.mxu0 %v2084_v24  ;;  %v2139_v11 = vld [vmem:[%s2767_s1 + $0x1c0] sm:$0xff]  ;;  %v2077_v15 = vld [vmem:[%s2769_s0 + $0x4c] sm:$0xf0]  ;;  %v2078_v17 = vld [vmem:[%s2769_s0 + $0x54] sm:$0xf0] }
  0x1b   :  { %1164 = vmatpush.bf16.msra.mxu1 %v2092_v25  ;;  %v2069_v18 = vld [vmem:[%s2769_s0 + $0x14] sm:$0xf]  ;;  %v2070_v20 = vld [vmem:[%s2769_s0 + $0x1c] sm:$0xf]  ;;  %v1478_v24 = vor.u32 %v2077_v15, %v1477_v14  ;;  %v1486_v25 = vor.u32 %v2078_v17, %v1485_v16  ;;  %v2168_v34 = vld [vmem:[%s2767_s1 + $0x2a8] sm:$0xff] }
  0x1c   :  { %1178 = vmatpush.bf16.msra.mxu2 %v2100_v26  ;;  %v1479_v19 = vld [vmem:[%s2769_s0 + $0x50] sm:$0xf0]  ;;  %v1487_v21 = vld [vmem:[%s2769_s0 + $0x58] sm:$0xf0]  ;;  %v2176_v35 = vld [vmem:[%s2767_s1 + $0x2e8] sm:$0xff] }
  0x1d   :  { %1192 = vmatpush.bf16.msra.mxu3 %v2108_v27  ;;  %v2170_v22 = vld [vmem:[%s2767_s1 + $0x2b8] sm:$0xff]  ;;  %v1482_v26 = vor.u32 %v2069_v18, %v1479_v19  ;;  %v1490_v27 = vor.u32 %v2070_v20, %v1487_v21  ;;  %v2151_v36 = vld [vmem:[%s2767_s1 + $0x220] sm:$0xff]  ;;  %v2200_v14 = vld [vmem:[%s2767_s1 + $0x3a8] sm:$0xff] }
  0x1e   :  { %1151 = vmatpush.bf16.msra.mxu0 %v2083_v28  ;;  %v2178_v23 = vld [vmem:[%s2767_s1 + $0x2f8] sm:$0xff]  ;;  %v2153_v28 = vld [vmem:[%s2767_s1 + $0x230] sm:$0xff]  ;;  %v2159_v37 = vld [vmem:[%s2767_s1 + $0x260] sm:$0xff] }
  0x1f   :  { %1165 = vmatpush.bf16.msra.mxu1 %v2091_v29  ;;  %v2161_v29 = vld [vmem:[%s2767_s1 + $0x270] sm:$0xff]  ;;  %v2167_v38 = vld [vmem:[%s2767_s1 + $0x2a0] sm:$0xff]  ;;  %v2150_v40 = vld [vmem:[%s2767_s1 + $0x218] sm:$0xff] }
  0x20   :  { %1179 = vmatpush.bf16.msra.mxu2 %v2099_v30  ;;  %v2169_v30 = vld [vmem:[%s2767_s1 + $0x2b0] sm:$0xff]  ;;  %v2175_v39 = vld [vmem:[%s2767_s1 + $0x2e0] sm:$0xff]  ;;  %v2158_v41 = vld [vmem:[%s2767_s1 + $0x258] sm:$0xff] }
  0x21   :  { %1193 = vmatpush.bf16.msra.mxu3 %v2107_v31  ;;  %1152 = vmatmul.bf16.vlgmr.msra.gmra.mxu0 %v1462_v44  ;;  %v2177_v31 = vld [vmem:[%s2767_s1 + $0x2f0] sm:$0xff]  ;;  %v2208_v15 = vld [vmem:[%s2767_s1 + $0x3e8] sm:$0xff]  ;;  %v2183_v16 = vld [vmem:[%s2767_s1 + $0x320] sm:$0xff] }
  0x22   :  { %1200 = vmatpush.bf16.msrb.mxu0 %v2122_v32  ;;  %1166 = vmatmul.bf16.vlgmr.msra.gmra.mxu1 %v1466_v46  ;;  %v2152_v32 = vld [vmem:[%s2767_s1 + $0x228] sm:$0xff]  ;;  %v2149_v44 = vld [vmem:[%s2767_s1 + $0x210] sm:$0xff]  ;;  %v2191_v17 = vld [vmem:[%s2767_s1 + $0x360] sm:$0xff] }
  0x23   :  { %1214 = vmatpush.bf16.msrb.mxu1 %v2130_v33  ;;  %1180 = vmatmul.bf16.vlgmr.msra.gmra.mxu2 %v1470_v45  ;;  %v2160_v33 = vld [vmem:[%s2767_s1 + $0x268] sm:$0xff]  ;;  %v2157_v45 = vld [vmem:[%s2767_s1 + $0x250] sm:$0xff]  ;;  %v2199_v18 = vld [vmem:[%s2767_s1 + $0x3a0] sm:$0xff] }
  0x24   :  { %1228 = vmatpush.bf16.msrb.mxu2 %v2138_v42  ;;  %1194 = vmatmul.bf16.vlgmr.msra.gmra.mxu3 %v1474_v47  ;;  %v2166_v42 = vld [vmem:[%s2767_s1 + $0x298] sm:$0xff]  ;;  %v2165_v46 = vld [vmem:[%s2767_s1 + $0x290] sm:$0xff]  ;;  %v2207_v19 = vld [vmem:[%s2767_s1 + $0x3e0] sm:$0xff] }
  0x25   :  { %1242 = vmatpush.bf16.msrb.mxu3 %v2146_v43  ;;  %v2174_v43 = vld [vmem:[%s2767_s1 + $0x2d8] sm:$0xff]  ;;  %v2173_v47 = vld [vmem:[%s2767_s1 + $0x2d0] sm:$0xff] }
  0x26   :  { %1201 = vmatpush.bf16.msrb.mxu0 %v2121_v48  ;;  %v2148_v48 = vld [vmem:[%s2767_s1 + $0x208] sm:$0xff]  ;;  %v2182_v20 = vld [vmem:[%s2767_s1 + $0x318] sm:$0xff] }
  0x27   :  { %1215 = vmatpush.bf16.msrb.mxu1 %v2129_v49  ;;  %v2156_v49 = vld [vmem:[%s2767_s1 + $0x248] sm:$0xff]  ;;  %v2190_v21 = vld [vmem:[%s2767_s1 + $0x358] sm:$0xff] }
  0x28   :  { %1229 = vmatpush.bf16.msrb.mxu2 %v2137_v50  ;;  %v2164_v50 = vld [vmem:[%s2767_s1 + $0x288] sm:$0xff] }
  0x29   :  { %1243 = vmatpush.bf16.msrb.mxu3 %v2145_v51  ;;  %v2172_v51 = vld [vmem:[%s2767_s1 + $0x2c8] sm:$0xff] }
  0x2a   :  { %1202 = vmatpush.bf16.msrb.mxu0 %v2120_v52  ;;  %v2147_v52 = vld [vmem:[%s2767_s1 + $0x200] sm:$0xff] }
  0x2b   :  { %1216 = vmatpush.bf16.msrb.mxu1 %v2128_v53  ;;  %v2155_v53 = vld [vmem:[%s2767_s1 + $0x240] sm:$0xff] }
  0x2c   :  { %1230 = vmatpush.bf16.msrb.mxu2 %v2136_v54  ;;  %v2163_v54 = vld [vmem:[%s2767_s1 + $0x280] sm:$0xff] }
  0x2d   :  { %1244 = vmatpush.bf16.msrb.mxu3 %v2144_v55  ;;  %v2171_v55 = vld [vmem:[%s2767_s1 + $0x2c0] sm:$0xff] }
  0x2e   :  { %1203 = vmatpush.bf16.msrb.mxu0 %v2119_v56  ;;  %v2186_v56 = vld [vmem:[%s2767_s1 + $0x338] sm:$0xff] }
  0x2f   :  { %1217 = vmatpush.bf16.msrb.mxu1 %v2127_v57  ;;  %v2194_v57 = vld [vmem:[%s2767_s1 + $0x378] sm:$0xff] }
  0x30   :  { %1231 = vmatpush.bf16.msrb.mxu2 %v2135_v58  ;;  %v1493_v58 = vld [vmem:[%s2769_s0 + $0x20] sm:$0xf] }
  0x31   :  { %1245 = vmatpush.bf16.msrb.mxu3 %v2143_v59  ;;  %v2079_v59 = vld [vmem:[%s2769_s0 + $0x5c] sm:$0xf0] }
  0x32   :  { %1204 = vmatpush.bf16.msrb.mxu0 %v2118_v60  ;;  %v1501_v60 = vld [vmem:[%s2769_s0 + $0x28] sm:$0xf] }
  0x33   :  { %1218 = vmatpush.bf16.msrb.mxu1 %v2126_v61  ;;  %v2080_v61 = vld [vmem:[%s2769_s0 + $0x64] sm:$0xf0] }
  0x34   :  { %1232 = vmatpush.bf16.msrb.mxu2 %v2134_v62  ;;  %v2071_v62 = vld [vmem:[%s2769_s0 + $0x24] sm:$0xf] }
  0x35   :  { %1246 = vmatpush.bf16.msrb.mxu3 %v2142_v63  ;;  %v1495_v63 = vld [vmem:[%s2769_s0 + $0x60] sm:$0xf0] }
  0x36   :  { %1205 = vmatpush.bf16.msrb.mxu0 %v2117_v0  ;;  %v2072_v0 = vld [vmem:[%s2769_s0 + $0x2c] sm:$0xf] }
  0x37   :  { %1219 = vmatpush.bf16.msrb.mxu1 %v2125_v1  ;;  %v1503_v1 = vld [vmem:[%s2769_s0 + $0x68] sm:$0xf0] }
  0x38   :  { %1233 = vmatpush.bf16.msrb.mxu2 %v2133_v2  ;;  %v2202_v2 = vld [vmem:[%s2767_s1 + $0x3b8] sm:$0xff] }
  0x39   :  { %1247 = vmatpush.bf16.msrb.mxu3 %v2141_v3  ;;  %v2210_v3 = vld [vmem:[%s2767_s1 + $0x3f8] sm:$0xff] }
  0x3a   :  { %1206 = vmatpush.bf16.msrb.mxu0 %v2116_v4  ;;  %v1494_v4 = vor.u32 %v2079_v59, %v1493_v58 }
  0x3b   :  { %1220 = vmatpush.bf16.msrb.mxu1 %v2124_v5  ;;  %v1502_v5 = vor.u32 %v2080_v61, %v1501_v60 }
  0x3c   :  { %1234 = vmatpush.bf16.msrb.mxu2 %v2132_v6  ;;  %v1498_v6 = vor.u32 %v2071_v62, %v1495_v63  ;;  %v2216_v62 = vld [vmem:[%s2771_s3 + $0x28] sm:$0xff] }
  0x3d   :  { %1248 = vmatpush.bf16.msrb.mxu3 %v2140_v7  ;;  %v1506_v7 = vor.u32 %v2072_v0, %v1503_v1 }
  0x3e   :  { %1207 = vmatpush.bf16.msrb.mxu0 %v2115_v8  ;;  %v2185_v8 = vld [vmem:[%s2767_s1 + $0x330] sm:$0xff] }
  0x3f   :  { %1221 = vmatpush.bf16.msrb.mxu1 %v2123_v9  ;;  %v2193_v9 = vld [vmem:[%s2767_s1 + $0x370] sm:$0xff] }
  0x40   :  { %1235 = vmatpush.bf16.msrb.mxu2 %v2131_v10  ;;  %v2201_v10 = vld [vmem:[%s2767_s1 + $0x3b0] sm:$0xff] }
  0x41   :  { %1249 = vmatpush.bf16.msrb.mxu3 %v2139_v11  ;;  %1208 = vmatmul.bf16.vlgmr.msrb.gmra.mxu0 %v1478_v24  ;;  %v2209_v11 = vld [vmem:[%s2767_s1 + $0x3f0] sm:$0xff] }
  0x42   :  { %1256 = vmatpush.bf16.msra.mxu0 %v2154_v12  ;;  %1222 = vmatmul.bf16.vlgmr.msrb.gmra.mxu1 %v1482_v26  ;;  %v2184_v12 = vld [vmem:[%s2767_s1 + $0x328] sm:$0xff]  ;;  %v2181_v24 = vld [vmem:[%s2767_s1 + $0x310] sm:$0xff] }
  0x43   :  { %1270 = vmatpush.bf16.msra.mxu1 %v2162_v13  ;;  %1236 = vmatmul.bf16.vlgmr.msrb.gmra.mxu2 %v1486_v25  ;;  %v2192_v13 = vld [vmem:[%s2767_s1 + $0x368] sm:$0xff]  ;;  %v2189_v25 = vld [vmem:[%s2767_s1 + $0x350] sm:$0xff] }
  0x44   :  { %1284 = vmatpush.bf16.msra.mxu2 %v2170_v22  ;;  %1250 = vmatmul.bf16.vlgmr.msrb.gmra.mxu3 %v1490_v27  ;;  %v2198_v22 = vld [vmem:[%s2767_s1 + $0x398] sm:$0xff]  ;;  %v2197_v26 = vld [vmem:[%s2767_s1 + $0x390] sm:$0xff] }
  0x45   :  { %1298 = vmatpush.bf16.msra.mxu3 %v2178_v23  ;;  %v2206_v23 = vld [vmem:[%s2767_s1 + $0x3d8] sm:$0xff]  ;;  %v2205_v27 = vld [vmem:[%s2767_s1 + $0x3d0] sm:$0xff] }
  0x46   :  { %1257 = vmatpush.bf16.msra.mxu0 %v2153_v28  ;;  %v2180_v28 = vld [vmem:[%s2767_s1 + $0x308] sm:$0xff] }
  0x47   :  { %1271 = vmatpush.bf16.msra.mxu1 %v2161_v29  ;;  %v2188_v29 = vld [vmem:[%s2767_s1 + $0x348] sm:$0xff] }
  0x48   :  { %1285 = vmatpush.bf16.msra.mxu2 %v2169_v30  ;;  %v2196_v30 = vld [vmem:[%s2767_s1 + $0x388] sm:$0xff] }
  0x49   :  { %1299 = vmatpush.bf16.msra.mxu3 %v2177_v31  ;;  %v2204_v31 = vld [vmem:[%s2767_s1 + $0x3c8] sm:$0xff] }
  0x4a   :  { %1258 = vmatpush.bf16.msra.mxu0 %v2152_v32  ;;  %v2179_v32 = vld [vmem:[%s2767_s1 + $0x300] sm:$0xff] }
  0x4b   :  { %1272 = vmatpush.bf16.msra.mxu1 %v2160_v33  ;;  %v2187_v33 = vld [vmem:[%s2767_s1 + $0x340] sm:$0xff] }
  0x4c   :  { %1286 = vmatpush.bf16.msra.mxu2 %v2168_v34  ;;  %v2195_v34 = vld [vmem:[%s2767_s1 + $0x380] sm:$0xff] }
  0x4d   :  { %1300 = vmatpush.bf16.msra.mxu3 %v2176_v35  ;;  %v2203_v35 = vld [vmem:[%s2767_s1 + $0x3c0] sm:$0xff] }
  0x4e   :  { %1259 = vmatpush.bf16.msra.mxu0 %v2151_v36  ;;  %v1509_v36 = vld [vmem:[%s2769_s0 + $0x30] sm:$0xf] }
  0x4f   :  { %1273 = vmatpush.bf16.msra.mxu1 %v2159_v37  ;;  %v2081_v37 = vld [vmem:[%s2769_s0 + $0x6c] sm:$0xf0] }
  0x50   :  { %1287 = vmatpush.bf16.msra.mxu2 %v2167_v38  ;;  %v2073_v38 = vld [vmem:[%s2769_s0 + $0x34] sm:$0xf] }
  0x51   :  { %1301 = vmatpush.bf16.msra.mxu3 %v2175_v39  ;;  %v1511_v39 = vld [vmem:[%s2769_s0 + $0x70] sm:$0xf0] }
  0x52   :  { %1260 = vmatpush.bf16.msra.mxu0 %v2150_v40  ;;  %v1517_v40 = vld [vmem:[%s2769_s0 + $0x38] sm:$0xf] }
  0x53   :  { %1274 = vmatpush.bf16.msra.mxu1 %v2158_v41  ;;  %v2082_v41 = vld [vmem:[%s2769_s0 + $0x74] sm:$0xf0] }
  0x54   :  { %1288 = vmatpush.bf16.msra.mxu2 %v2166_v42  ;;  %v2074_v42 = vld [vmem:[%s2769_s0 + $0x3c] sm:$0xf] }
  0x55   :  { %1302 = vmatpush.bf16.msra.mxu3 %v2174_v43  ;;  %v1519_v43 = vld [vmem:[%s2769_s0 + $0x78] sm:$0xf0] }
  0x56   :  { %1261 = vmatpush.bf16.msra.mxu0 %v2149_v44  ;;  %v1510_v44 = vor.u32 %v2081_v37, %v1509_v36 }
  0x57   :  { %1275 = vmatpush.bf16.msra.mxu1 %v2157_v45  ;;  %v1514_v45 = vor.u32 %v2073_v38, %v1511_v39 }
  0x58   :  { %1289 = vmatpush.bf16.msra.mxu2 %v2165_v46  ;;  %v1518_v46 = vor.u32 %v2082_v41, %v1517_v40 }
  0x59   :  { %1303 = vmatpush.bf16.msra.mxu3 %v2173_v47  ;;  %v1522_v47 = vor.u32 %v2074_v42, %v1519_v43 }
  0x5a   :  { %1262 = vmatpush.bf16.msra.mxu0 %v2148_v48 }
  0x5b   :  { %1276 = vmatpush.bf16.msra.mxu1 %v2156_v49 }
  0x5c   :  { %1290 = vmatpush.bf16.msra.mxu2 %v2164_v50 }
  0x5d   :  { %1304 = vmatpush.bf16.msra.mxu3 %v2172_v51 }
  0x5e   :  { %1263 = vmatpush.bf16.msra.mxu0 %v2147_v52 }
  0x5f   :  { %1277 = vmatpush.bf16.msra.mxu1 %v2155_v53  ;;  %v2218_v53 = vld [vmem:[%s2771_s3 + $0x38] sm:$0xff] }
  0x60   :  { %1291 = vmatpush.bf16.msra.mxu2 %v2163_v54 }
  0x61   :  { %1305 = vmatpush.bf16.msra.mxu3 %v2171_v55  ;;  %1264 = vmatmul.bf16.vlgmr.msra.gmra.mxu0 %v1494_v4  ;;  %v2217_v55 = vld [vmem:[%s2771_s3 + $0x30] sm:$0xff] }
  0x62   :  { %1312 = vmatpush.bf16.msrb.mxu0 %v2186_v56  ;;  %1278 = vmatmul.bf16.vlgmr.msra.gmra.mxu1 %v1498_v6  ;;  %v2219_v56 = vld [vmem:[%s2768_s2] ss:$0 sm:$0xff] }
  0x63   :  { %1326 = vmatpush.bf16.msrb.mxu1 %v2194_v57  ;;  %1292 = vmatmul.bf16.vlgmr.msra.gmra.mxu2 %v1502_v5 }
  0x64   :  { %1340 = vmatpush.bf16.msrb.mxu2 %v2202_v2  ;;  %1306 = vmatmul.bf16.vlgmr.msra.gmra.mxu3 %v1506_v7  ;;  %v2214_v7 = vld [vmem:[%s2771_s3 + $0x18] sm:$0xff] }
  0x65   :  { %1354 = vmatpush.bf16.msrb.mxu3 %v2210_v3  ;;  %v2215_v3 = vld [vmem:[%s2771_s3 + $0x20] sm:$0xff] }
  0x66   :  { %1313 = vmatpush.bf16.msrb.mxu0 %v2185_v8 }
  0x67   :  { %1327 = vmatpush.bf16.msrb.mxu1 %v2193_v9 }
  0x68   :  { %1341 = vmatpush.bf16.msrb.mxu2 %v2201_v10 }
  0x69   :  { %1355 = vmatpush.bf16.msrb.mxu3 %v2209_v11  ;;  %v2213_v11 = vld [vmem:[%s2771_s3 + $0x10] sm:$0xff] }
  0x6a   :  { %1314 = vmatpush.bf16.msrb.mxu0 %v2184_v12 }
  0x6b   :  { %1328 = vmatpush.bf16.msrb.mxu1 %v2192_v13 }
  0x6c   :  { %1342 = vmatpush.bf16.msrb.mxu2 %v2200_v14 }
  0x6d   :  { %1356 = vmatpush.bf16.msrb.mxu3 %v2208_v15 }
  0x6e   :  { %1315 = vmatpush.bf16.msrb.mxu0 %v2183_v16 }
  0x6f   :  { %1329 = vmatpush.bf16.msrb.mxu1 %v2191_v17  ;;  %v2212_v17 = vld [vmem:[%s2771_s3 + $0x8] sm:$0xff] }
  0x70   :  { %1343 = vmatpush.bf16.msrb.mxu2 %v2199_v18 }
  0x71   :  { %1357 = vmatpush.bf16.msrb.mxu3 %v2207_v19 }
  0x72   :  { %1316 = vmatpush.bf16.msrb.mxu0 %v2182_v20 }
  0x73   :  { %1330 = vmatpush.bf16.msrb.mxu1 %v2190_v21  ;;  %v2211_v21 = vld [vmem:[%s2771_s3] sm:$0xff] }
  0x74   :  { %1344 = vmatpush.bf16.msrb.mxu2 %v2198_v22 }
  0x75   :  { %1358 = vmatpush.bf16.msrb.mxu3 %v2206_v23 }
  0x76   :  { %1317 = vmatpush.bf16.msrb.mxu0 %v2181_v24 }
  0x77   :  { %1331 = vmatpush.bf16.msrb.mxu1 %v2189_v25 }
  0x78   :  { %1345 = vmatpush.bf16.msrb.mxu2 %v2197_v26 }
  0x79   :  { %1359 = vmatpush.bf16.msrb.mxu3 %v2205_v27 }
  0x7a   :  { %1318 = vmatpush.bf16.msrb.mxu0 %v2180_v28 }
  0x7b   :  { %1332 = vmatpush.bf16.msrb.mxu1 %v2188_v29 }
  0x7c   :  { %1346 = vmatpush.bf16.msrb.mxu2 %v2196_v30 }
  0x7d   :  { %1360 = vmatpush.bf16.msrb.mxu3 %v2204_v31 }
  0x7e   :  { %1319 = vmatpush.bf16.msrb.mxu0 %v2179_v32 }
  0x7f   :  { %1333 = vmatpush.bf16.msrb.mxu1 %v2187_v33 }
  0x80   :  { %1347 = vmatpush.bf16.msrb.mxu2 %v2195_v34 }
  0x81   :  { %1361 = vmatpush.bf16.msrb.mxu3 %v2203_v35  ;;  %1320 = vmatmul.bf16.vlgmr.msrb.gmra.mxu0 %v1510_v44 }
  0x82   :  { %1334 = vmatmul.bf16.vlgmr.msrb.gmra.mxu1 %v1514_v45  ;;  %1439 = vmatpush.bf16.msra.mxu0 %v2218_v53 }
  0x83   :  { %1348 = vmatmul.bf16.vlgmr.msrb.gmra.mxu2 %v1518_v46 }
  0x84   :  { %1362 = vmatmul.bf16.vlgmr.msrb.gmra.mxu3 %v1522_v47 }
  0x86   :  { %1440 = vmatpush.bf16.msra.mxu0 %v2217_v55 }
  0x8a   :  { %1441 = vmatpush.bf16.msra.mxu0 %v2216_v62 }
  0x8e   :  { %1442 = vmatpush.bf16.msra.mxu0 %v2215_v3 }
  0x92   :  { %1443 = vmatpush.bf16.msra.mxu0 %v2214_v7 }
  0x96   :  { %1444 = vmatpush.bf16.msra.mxu0 %v2213_v11 }
  0x9a   :  { %1445 = vmatpush.bf16.msra.mxu0 %v2212_v17 }
  0x9e   :  { %v1153_v48 = vpop.f32.mrf.mxu0  ;;  %1446 = vmatpush.bf16.msra.mxu0 %v2211_v21 }
  0x9f   :  { %v1167_v49 = vpop.f32.mrf.mxu1  ;;  %v1154_v59 = vadd.f32 %v2219_v56, %v1153_v48 }
  0xa1   :  { %v1168_v63 = vadd.f32 %v1167_v49, %v1154_v59 }
  0xa6   :  { %v1181_v50 = vpop.f32.mrf.mxu2  ;;  %v1155_v52 = vpop.f32.mrf.mxu0 }
  0xa7   :  { %v1195_v51 = vpop.f32.mrf.mxu3  ;;  %v1169_v54 = vpop.f32.mrf.mxu1  ;;  %v1156_v0 = vadd.f32 %v2219_v56, %v1155_v52  ;;  %v1182_v4 = vadd.f32 %v1181_v50, %v1168_v63 }
  0xa9   :  { %v1170_v5 = vadd.f32 %v1169_v54, %v1156_v0  ;;  %v1196_v8 = vadd.f32 %v1195_v51, %v1182_v4 }
  0xae   :  { %v1183_v57 = vpop.f32.mrf.mxu2 }
  0xaf   :  { %v1197_v58 = vpop.f32.mrf.mxu3  ;;  %v1184_v10 = vadd.f32 %v1183_v57, %v1170_v5 }
  0xb1   :  { %v1198_v15 = vadd.f32 %v1197_v58, %v1184_v10 }
  0xbe   :  { %v1209_v60 = vpop.f32.mrf.mxu0 }
  0xbf   :  { %v1223_v61 = vpop.f32.mrf.mxu1  ;;  %v1210_v12 = vadd.f32 %v1209_v60, %v1196_v8  ;;  %v2220_v60 = vld [vmem:[%s2770_s4] ss:$0 sm:$0xff] }
  0xc1   :  { %v1224_v18 = vadd.f32 %v1223_v61, %v1210_v12 }
  0xc6   :  { %v1237_v1 = vpop.f32.mrf.mxu2  ;;  %v1211_v6 = vpop.f32.mrf.mxu0 }
  0xc7   :  { %v1251_v2 = vpop.f32.mrf.mxu3  ;;  %v1225_v9 = vpop.f32.mrf.mxu1  ;;  %v1212_v20 = vadd.f32 %v1211_v6, %v1198_v15  ;;  %v1238_v22 = vadd.f32 %v1237_v1, %v1224_v18 }
  0xc9   :  { %v1226_v25 = vadd.f32 %v1225_v9, %v1212_v20  ;;  %v1252_v26 = vadd.f32 %v1251_v2, %v1238_v22 }
  0xce   :  { %v1239_v13 = vpop.f32.mrf.mxu2 }
  0xcf   :  { %v1253_v14 = vpop.f32.mrf.mxu3  ;;  %v1240_v27 = vadd.f32 %v1239_v13, %v1226_v25 }
  0xd1   :  { %v1254_v31 = vadd.f32 %v1253_v14, %v1240_v27 }
  0xde   :  { %v1265_v16 = vpop.f32.mrf.mxu0 }
  0xdf   :  { %v1279_v19 = vpop.f32.mrf.mxu1  ;;  %v1266_v29 = vadd.f32 %v1265_v16, %v1252_v26 }
  0xe1   :  { %v1280_v32 = vadd.f32 %v1279_v19, %v1266_v29 }
  0xe6   :  { %v1293_v23 = vpop.f32.mrf.mxu2  ;;  %v1267_v28 = vpop.f32.mrf.mxu0 }
  0xe7   :  { %v1307_v24 = vpop.f32.mrf.mxu3  ;;  %v1281_v30 = vpop.f32.mrf.mxu1  ;;  %v1268_v33 = vadd.f32 %v1267_v28, %v1254_v31  ;;  %v1294_v36 = vadd.f32 %v1293_v23, %v1280_v32 }
  0xe9   :  { %v1282_v38 = vadd.f32 %v1281_v30, %v1268_v33  ;;  %v1308_v40 = vadd.f32 %v1307_v24, %v1294_v36 }
  0xee   :  { %v1295_v34 = vpop.f32.mrf.mxu2 }
  0xef   :  { %v1309_v35 = vpop.f32.mrf.mxu3  ;;  %v1296_v41 = vadd.f32 %v1295_v34, %v1282_v38 }
  0xf1   :  { %v1310_v45 = vadd.f32 %v1309_v35, %v1296_v41 }
  0xfe   :  { %v1321_v37 = vpop.f32.mrf.mxu0 }
  0xff   :  { %v1335_v39 = vpop.f32.mrf.mxu1  ;;  %v1322_v42 = vadd.f32 %v1321_v37, %v1308_v40 }
 0x101   :  { %v1336_v47 = vadd.f32 %v1335_v39, %v1322_v42 }
 0x106   :  { %v1349_v43 = vpop.f32.mrf.mxu2  ;;  %v1323_v46 = vpop.f32.mrf.mxu0 }
 0x107   :  { %v1363_v44 = vpop.f32.mrf.mxu3  ;;  %v1324_v48 = vadd.f32 %v1323_v46, %v1310_v45  ;;  %v1350_v49 = vadd.f32 %v1349_v43, %v1336_v47  ;;  %v1337_v50 = vpop.f32.mrf.mxu1 }
 0x109   :  { %v1338_v51 = vadd.f32 %v1337_v50, %v1324_v48  ;;  %v1364_v53 = vadd.f32 %v1363_v44, %v1350_v49 }
 0x10b   :  { %v1368_v57 = vmax.f32 %v1364_v53, 0.0 }
 0x10e   :  { %v1351_v52 = vpop.f32.mrf.mxu2 }
 0x10f   :  { %v1352_v54 = vadd.f32 %v1351_v52, %v1338_v51  ;;  %v1365_v55 = vpop.f32.mrf.mxu3 }
 0x111   :  { %v1366_v56 = vadd.f32 %v1365_v55, %v1352_v54 }
 0x113   :  { %v1369_v58 = vmax.f32 %v1366_v56, 0.0 }
 0x115   :  { %v1370_v59 = vpack.c.bf16 %v1369_v58, %v1368_v57 }
 0x117   :  { %1447 = vmatmul.bf16.vlgmr.msra.gmra.mxu0 %v1370_v59 }
 0x194   :  { %v1448_v61 = vpop.f32.mrf.mxu0 }
 0x195   :  { %v1449_v62 = vadd.f32 %v2220_v60, %v1448_v61 }
 0x197   :  { %1453 = vst [vmem:[%s2772_s5] sm:$0xff] %v1449_v62 }
 0x19c   :  { %v1450_v63 = vpop.f32.mrf.mxu0 }
 0x19d   :  { %v1451_v0 = vadd.f32 %v2220_v60, %v1450_v63 }
 0x19f   :  { %1454 = vst [vmem:[%s2772_s5 + $0x8] sm:$0xff] %v1451_v0 }

</bundles_post_ra>
